<compile_context>
chip_gen: v6e
topology: v6e:2x2x1
jax: 0.10.0
libtpu: 0.0.40
codegen_flags: <defaults>
</compile_context>

<pallas_src>
import functools

import numpy as np
import jax
import jax.numpy as jnp
from jax.experimental import pallas as pl
from jax.experimental.pallas import tpu as pltpu

LANE = 128          # TPU lane width: every weight segment is LANE columns wide
DIN_PAD = 128       # node-feature width padded to one full lane group


def _gelu_erf(x):
    # Exact-erf GELU (torch.nn.GELU default). erf via the Abramowitz & Stegun
    # 7.1.26 rational approximation (max abs err ~1.5e-7): only exp/mul/add/
    # select, guaranteed to lower on Mosaic.
    z = x * jnp.float32(0.7071067811865476)
    a = jnp.abs(z)
    t = 1.0 / (1.0 + jnp.float32(0.3275911) * a)
    poly = t * (jnp.float32(0.254829592)
                + t * (jnp.float32(-0.284496736)
                       + t * (jnp.float32(1.421413741)
                              + t * (jnp.float32(-1.453152027)
                                     + t * jnp.float32(1.061405429)))))
    erf_abs = 1.0 - poly * jnp.exp(-a * a)
    erf = jnp.where(z >= 0, erf_abs, -erf_abs)
    return 0.5 * x * (1.0 + erf)


def transformer_conv_kernel(h_all_ref, h_tile_ref, mask_ref, e_ref,
                            wf_ref, bf_ref, o_ref,
                            *, heads, d, concat, apply_gelu):
    """One TransformerConv layer for one tile of destination nodes.

    h_all_ref : (N, DIN_PAD)            all source-node features (lane-padded)
    h_tile_ref: (tm, DIN_PAD)           this tile's destination-node features
    mask_ref  : (tm, N)                 1.0 where edge j->i exists
    e_ref     : (H, tm, N, D) bf16      dense per-edge features e_{h,i,j,:}
    wf_ref    : (DIN_PAD, (3H+1)*LANE)  fused [q_h..|k_h..|v_h..|skip], 128-aligned
    bf_ref    : (1, (3H+1)*LANE)
    o_ref     : (tm, DIN_PAD)           lane-padded layer output
    """
    H, D = heads, d
    wf = wf_ref[...]
    bf = bf_ref[...]

    # Fused projections: one MXU matmul for all nodes (k, v) and one for this
    # tile's destination rows (q, skip).  1/sqrt(D) already folded into W_q.
    proj_all = jnp.dot(h_all_ref[...], wf, preferred_element_type=jnp.float32) + bf
    proj_tile = jnp.dot(h_tile_ref[...], wf, preferred_element_type=jnp.float32) + bf

    mask = mask_ref[...]                                   # (tm, N)
    neg_bias = (mask - 1.0) * jnp.float32(1e30)            # 0 on edges, -1e30 off

    head_outs = []
    for hh in range(H):                                    # H = 2, statically unrolled
        q = proj_tile[:, hh * LANE: hh * LANE + D]                     # (tm, D)
        k = proj_all[:, (H + hh) * LANE: (H + hh) * LANE + D]          # (N, D)
        v = proj_all[:, (2 * H + hh) * LANE: (2 * H + hh) * LANE + D]  # (N, D)
        e = e_ref[hh]                                                  # (tm, N, D) bf16

        # All four contractions on the MXU; the edge terms use the batched
        # flash-attention einsum patterns (batch = destination row).
        s_qk = jax.lax.dot_general(q, k, (((1,), (1,)), ((), ())),
                                   preferred_element_type=jnp.float32)   # (tm, N)
        q3 = q[:, None, :].astype(e.dtype)                                # (tm, 1, D)
        s_qe = jnp.einsum('bqd,bkd->bqk', q3, e,
                          preferred_element_type=jnp.float32)[:, 0, :]    # (tm, N)
        scores = s_qk + s_qe + neg_bias

        # Masked softmax over incoming edges; rows with no edges -> all zeros.
        m = jnp.max(scores, axis=-1, keepdims=True)
        p = jnp.exp(scores - m) * mask
        denom = jnp.sum(p, axis=-1, keepdims=True)
        inv = jnp.where(denom > 0.0, pl.reciprocal(denom, approx=True),
                        jnp.float32(0.0))
        alpha = p * inv                                                   # (tm, N)

        agg = jnp.dot(alpha, v, preferred_element_type=jnp.float32)       # (tm, D)
        a3 = alpha[:, None, :].astype(e.dtype)                             # (tm, 1, N)
        corr = jnp.einsum('bqk,bkd->bqd', a3, e,
                          preferred_element_type=jnp.float32)[:, 0, :]     # (tm, D)
        head_outs.append(agg + corr)

    skip_col = 3 * H * LANE
    if concat:
        skip = proj_tile[:, skip_col:skip_col + H * D]
        out = jnp.concatenate(head_outs, axis=-1) + skip                   # (tm, H*D)
    else:
        acc = head_outs[0]
        for t in head_outs[1:]:
            acc = acc + t
        skip = proj_tile[:, skip_col:skip_col + D]
        out = acc * jnp.float32(1.0 / H) + skip                            # (tm, D)

    if apply_gelu:
        out = _gelu_erf(out)

    # Build the lane-padded slab in registers -> single unmasked full-width store.
    pad = jnp.zeros((out.shape[0], DIN_PAD - out.shape[1]), jnp.float32)
    o_ref[...] = jnp.concatenate([out, pad], axis=-1)


def _pick_tile(n):
    # Largest sublane-aligned destination tile that still yields >=2 grid steps
    # (so the tile axis is actually pipelined / megacore-shardable on v7x).
    for t in (128, 64, 32, 16, 8):
        if n % t == 0 and n // t >= 2:
            return t
    return n


def _transformer_conv_layer(h_pad, mask, e_dense, wf, bf, *, heads, d,
                            concat, apply_gelu, tile_m):
    N = h_pad.shape[0]
    n_tiles = N // tile_m
    W = wf.shape[1]
    kern = functools.partial(transformer_conv_kernel, heads=heads, d=d,
                             concat=concat, apply_gelu=apply_gelu)
    return pl.pallas_call(
        kern,
        out_shape=jax.ShapeDtypeStruct((N, DIN_PAD), jnp.float32),
        grid=(n_tiles,),
        in_specs=[
            pl.BlockSpec((N, DIN_PAD), lambda t: (0, 0)),               # all nodes (k, v)
            pl.BlockSpec((tile_m, DIN_PAD), lambda t: (t, 0)),          # dest tile (q, skip)
            pl.BlockSpec((tile_m, N), lambda t: (t, 0)),                # mask rows
            pl.BlockSpec((heads, tile_m, N, d), lambda t: (0, t, 0, 0)),# dense edges (bf16)
            pl.BlockSpec((DIN_PAD, W), lambda t: (0, 0)),               # fused weights
            pl.BlockSpec((1, W), lambda t: (0, 0)),                     # fused biases
        ],
        out_specs=pl.BlockSpec((tile_m, DIN_PAD), lambda t: (t, 0)),
        compiler_params=pltpu.CompilerParams(
            dimension_semantics=("parallel",),           # dest tiles are independent
            vmem_limit_bytes=32 * 1024 * 1024),          # explicit (v5e default is 16 MiB)
    )(h_pad, h_pad, mask, e_dense, wf, bf)


def init_layer_params(key, *, din, edge_dim, heads, out_ch, concat):
    hd = heads * out_ch
    skip_dim = hd if concat else out_ch
    ks = jax.random.split(key, 9)
    s = 0.05
    return {
        "wq": s * jax.random.normal(ks[0], (din, hd), jnp.float32),
        "bq": s * jax.random.normal(ks[1], (hd,), jnp.float32),
        "wk": s * jax.random.normal(ks[2], (din, hd), jnp.float32),
        "bk": s * jax.random.normal(ks[3], (hd,), jnp.float32),
        "wv": s * jax.random.normal(ks[4], (din, hd), jnp.float32),
        "bv": s * jax.random.normal(ks[5], (hd,), jnp.float32),
        "wskip": s * jax.random.normal(ks[6], (din, skip_dim), jnp.float32),
        "bskip": s * jax.random.normal(ks[7], (skip_dim,), jnp.float32),
        "we": s * jax.random.normal(ks[8], (edge_dim, hd), jnp.float32),  # lin_edge, no bias
    }


def _fuse_layer_weights(p, *, heads, d):
    """Pack [Wq|Wk|Wv|Wskip] into (DIN_PAD, (3H+1)*LANE): every head's D-slice
    starts on a 128-lane boundary, 1/sqrt(d) folded into the q segment, input
    rows beyond `din` zero so lane-padded activations can be fed directly."""
    din = p["wq"].shape[0]
    H = heads
    W = (3 * H + 1) * LANE
    wf = np.zeros((DIN_PAD, W), np.float32)
    bf = np.zeros((1, W), np.float32)
    scale = 1.0 / np.sqrt(d)

    def put(seg, wmat, bvec, mult=1.0):
        c0 = seg * LANE
        w = np.asarray(wmat)
        b = np.asarray(bvec)
        wf[:din, c0:c0 + w.shape[1]] = w * mult
        bf[0, c0:c0 + b.shape[0]] = b * mult

    for hh in range(H):
        put(hh, p["wq"][:, hh * d:(hh + 1) * d], p["bq"][hh * d:(hh + 1) * d], scale)
        put(H + hh, p["wk"][:, hh * d:(hh + 1) * d], p["bk"][hh * d:(hh + 1) * d])
        put(2 * H + hh, p["wv"][:, hh * d:(hh + 1) * d], p["bv"][hh * d:(hh + 1) * d])
    put(3 * H, p["wskip"], p["bskip"])
    return jnp.asarray(wf), jnp.asarray(bf)


def init_params(key, vocab_size, D):
    H = 2
    ks = jax.random.split(key, 5)
    params = {
        "embed": 0.1 * jax.random.normal(ks[0], (vocab_size, D), jnp.float32),
        "embed_ee": 0.1 * jax.random.normal(ks[1], (7, D), jnp.float32),
        "l1": init_layer_params(ks[2], din=D, edge_dim=D, heads=H, out_ch=D, concat=True),
        "l2": init_layer_params(ks[3], din=2 * D, edge_dim=D, heads=H, out_ch=D, concat=True),
        "l3": init_layer_params(ks[4], din=2 * D, edge_dim=D, heads=H, out_ch=D, concat=False),
    }
    for name in ("l1", "l2", "l3"):
        wf, bf = _fuse_layer_weights(params[name], heads=H, d=D)
        params[name]["wf"] = wf
        params[name]["bf"] = bf
    return params


def graph_transformer_forward(params, x_tokens, edge_index, edge_index_readout,
                              edge_attr, batch):
    # `edge_index_readout` / `batch` accepted (reference signature) but unused.
    del edge_index_readout, batch
    N = x_tokens.shape[0]
    D = params["embed"].shape[1]
    H = 2
    tile_m = _pick_tile(N)

    # ---- plain-JAX glue: embedding gathers + fused sparse->dense edge scatter
    h = jnp.pad(params["embed"][x_tokens], ((0, 0), (0, DIN_PAD - D)))   # (N, 128)
    e_emb = params["embed_ee"][edge_attr]                                # (E, D)
    src, dst = edge_index[0], edge_index[1]
    mask = jnp.zeros((N, N), jnp.float32).at[dst, src].set(1.0)

    # All three layers' lin_edge projections: ONE matmul on the sparse rows and
    # ONE scatter, directly in the kernel layout (L, H, dst, src, D), bf16.
    we_all = jnp.concatenate([params["l1"]["we"], params["l2"]["we"],
                              params["l3"]["we"]], axis=1)               # (D, 3*H*D)
    ep = jnp.dot(e_emb, we_all).reshape(-1, 3, H, D)                     # (E, 3, H, D)
    ep = jnp.transpose(ep, (1, 2, 0, 3)).astype(jnp.bfloat16)            # (3, H, E, D)
    e_dense = (jnp.zeros((3, H, N, N, D), jnp.bfloat16)
               .at[:, :, dst, src].set(ep))

    layer_cfg = [("l1", True, True), ("l2", True, True), ("l3", False, False)]
    for li, (name, concat, gelu) in enumerate(layer_cfg):
        h = _transformer_conv_layer(h, mask, e_dense[li],
                                    params[name]["wf"], params[name]["bf"],
                                    heads=H, d=D, concat=concat,
                                    apply_gelu=gelu, tile_m=tile_m)
    return h[:, :D]                                                      # (N, D)


if __name__ == "__main__":
    key = jax.random.PRNGKey(0)
    k_params, k_x, k_e = jax.random.split(key, 3)

    hidden_size = 40            # config.hidden_size -> hidden_size // 5 = 8
    vocab_size = 30
    D = hidden_size // 5
    N = 16                      # number of graph nodes (2 destination tiles of 8)

    params = init_params(k_params, vocab_size, D)

    # Node tokens; token id 0 marks "readout" nodes selected at the end.
    x_np = np.array(jax.random.randint(k_x, (N,), 1, vocab_size), dtype=np.int32)
    x_np[0] = 0
    x_np[8] = 0
    x_tokens = jnp.asarray(x_np, jnp.int32)

    # Simple deterministic graph: bidirectional path + extra edges into node 0.
    edges = []
    for i in range(N - 1):
        edges.append((i, i + 1))
        edges.append((i + 1, i))
    for i in range(2, N):
        edges.append((i, 0))
    edge_index = jnp.asarray(np.asarray(edges, np.int32).T)              # (2, E)
    E = edge_index.shape[1]
    edge_attr = jax.random.randint(k_e, (E,), 0, 7).astype(jnp.int32)
    edge_index_readout = edge_index                                      # unused
    batch = jnp.zeros((N,), jnp.int32)                                   # unused

    h_nodes = graph_transformer_forward(params, x_tokens, edge_index,
                                        edge_index_readout, edge_attr, batch)

    # indices = (x == 0).nonzero().squeeze(); return h_nodes[indices]
    indices = np.nonzero(x_np == 0)[0]
    out = h_nodes[jnp.asarray(indices, jnp.int32)]

    jax.block_until_ready(out)
    assert out.shape == (len(indices), D)
    assert bool(jnp.all(jnp.isfinite(out)))
    print("KERNEL_OK")
</pallas_src>

<mosaic_0001>
module attributes {stable_mosaic.version = 11 : i64} {
  func.func @transformer_conv_kernel(%arg0: i32, %arg1: memref<16x128xf32, #tpu.memory_space<vmem>>, %arg2: memref<8x128xf32, #tpu.memory_space<vmem>>, %arg3: memref<8x16xf32, #tpu.memory_space<vmem>>, %arg4: memref<2x8x16x8xbf16, #tpu.memory_space<vmem>>, %arg5: memref<128x896xf32, #tpu.memory_space<vmem>>, %arg6: memref<1x896xf32, #tpu.memory_space<vmem>>, %arg7: memref<8x128xf32, #tpu.memory_space<vmem>>) attributes {dimension_semantics = [#tpu.dimension_semantics<parallel>], iteration_bounds = array<i64: 2>, scalar_prefetch = 0 : i64, scratch_operands = 0 : i64, tpu.core_type = #tpu.core_type<tc>, window_params = [{pipeline_mode = #tpu.pipeline_mode<synchronous>, transform_indices = @transform_0, window_bounds = array<i64: 16, 128>}, {transform_indices = @transform_1, window_bounds = array<i64: 8, 128>}, {transform_indices = @transform_2, window_bounds = array<i64: 8, 16>}, {transform_indices = @transform_3, window_bounds = array<i64: 2, 8, 16, 8>}, {pipeline_mode = #tpu.pipeline_mode<synchronous>, transform_indices = @transform_4, window_bounds = array<i64: 128, 896>}, {pipeline_mode = #tpu.pipeline_mode<synchronous>, transform_indices = @transform_5, window_bounds = array<i64: 1, 896>}, {transform_indices = @transform_6, window_bounds = array<i64: 8, 128>}]} {
    %c0 = arith.constant 0 : index
    %c0_0 = arith.constant 0 : index
    %0 = vector.load %arg5[%c0, %c0_0] : memref<128x896xf32, #tpu.memory_space<vmem>>, vector<128x896xf32>
    %c0_1 = arith.constant 0 : index
    %c0_2 = arith.constant 0 : index
    %1 = vector.load %arg6[%c0_1, %c0_2] : memref<1x896xf32, #tpu.memory_space<vmem>>, vector<1x896xf32>
    %c0_3 = arith.constant 0 : index
    %c0_4 = arith.constant 0 : index
    %2 = vector.load %arg1[%c0_3, %c0_4] : memref<16x128xf32, #tpu.memory_space<vmem>>, vector<16x128xf32>
    %cst = arith.constant dense<0.000000e+00> : vector<16x896xf32>
    %3 = tpu.matmul %2, %0, %cst {dimension_numbers = #tpu.dot_dimension_numbers<[1], [0], [0], [1], [0, 0, 1, 1], [], []>} : vector<16x128xf32>, vector<128x896xf32>, vector<16x896xf32> -> vector<16x896xf32>
    %4 = vector.broadcast %1 : vector<1x896xf32> to vector<16x896xf32>
    %5 = arith.addf %3, %4 : vector<16x896xf32>
    %c0_5 = arith.constant 0 : index
    %c0_6 = arith.constant 0 : index
    %6 = vector.load %arg2[%c0_5, %c0_6] : memref<8x128xf32, #tpu.memory_space<vmem>>, vector<8x128xf32>
    %cst_7 = arith.constant dense<0.000000e+00> : vector<8x896xf32>
    %7 = tpu.matmul %6, %0, %cst_7 {dimension_numbers = #tpu.dot_dimension_numbers<[1], [0], [0], [1], [0, 0, 1, 1], [], []>} : vector<8x128xf32>, vector<128x896xf32>, vector<8x896xf32> -> vector<8x896xf32>
    %8 = vector.broadcast %1 : vector<1x896xf32> to vector<8x896xf32>
    %9 = arith.addf %7, %8 : vector<8x896xf32>
    %c0_8 = arith.constant 0 : index
    %c0_9 = arith.constant 0 : index
    %10 = vector.load %arg3[%c0_8, %c0_9] : memref<8x16xf32, #tpu.memory_space<vmem>>, vector<8x16xf32>
    %cst_10 = arith.constant 1.000000e+00 : f32
    %11 = vector.broadcast %cst_10 : f32 to vector<8x16xf32>
    %12 = arith.subf %10, %11 : vector<8x16xf32>
    %cst_11 = arith.constant 1.000000e+30 : f32
    %13 = vector.broadcast %cst_11 : f32 to vector<8x16xf32>
    %14 = arith.mulf %12, %13 : vector<8x16xf32>
    %15 = vector.extract_strided_slice %9 {offsets = [0, 0], sizes = [8, 8], strides = [1, 1]} : vector<8x896xf32> to vector<8x8xf32>
    %16 = vector.extract_strided_slice %5 {offsets = [0, 256], sizes = [16, 8], strides = [1, 1]} : vector<16x896xf32> to vector<16x8xf32>
    %17 = vector.extract_strided_slice %5 {offsets = [0, 512], sizes = [16, 8], strides = [1, 1]} : vector<16x896xf32> to vector<16x8xf32>
    %c0_12 = arith.constant 0 : index
    %c0_13 = arith.constant 0 : index
    %c0_14 = arith.constant 0 : index
    %c0_15 = arith.constant 0 : index
    %18 = vector.load %arg4[%c0_12, %c0_13, %c0_14, %c0_15] : memref<2x8x16x8xbf16, #tpu.memory_space<vmem>>, vector<1x8x16x8xbf16>
    %19 = vector.shape_cast %18 : vector<1x8x16x8xbf16> to vector<8x16x8xbf16>
    %cst_16 = arith.constant dense<0.000000e+00> : vector<8x16xf32>
    %20 = tpu.matmul %15, %16, %cst_16 {dimension_numbers = #tpu.dot_dimension_numbers<[1], [1], [0], [0], [0, 0, 1, 0], [], []>} : vector<8x8xf32>, vector<16x8xf32>, vector<8x16xf32> -> vector<8x16xf32>
    %21 = vector.shape_cast %15 : vector<8x8xf32> to vector<8x1x8xf32>
    %22 = arith.truncf %21 : vector<8x1x8xf32> to vector<8x1x8xbf16>
    "tpu.trace_start"() <{level = 10 : i32, message = "bqd,bkd->bqk"}> : () -> ()
    %cst_17 = arith.constant dense<0.000000e+00> : vector<8x1x16xf32>
    %23 = tpu.matmul %22, %19, %cst_17 {dimension_numbers = #tpu.dot_dimension_numbers<[2], [2], [1], [1], [0, 0, 0, 1, 1, 1], [0], [0]>} : vector<8x1x8xbf16>, vector<8x16x8xbf16>, vector<8x1x16xf32> -> vector<8x1x16xf32>
    "tpu.trace_stop"() : () -> ()
    %24 = vector.shape_cast %23 : vector<8x1x16xf32> to vector<8x16xf32>
    %25 = arith.addf %20, %24 : vector<8x16xf32>
    %26 = arith.addf %25, %14 : vector<8x16xf32>
    %cst_18 = arith.constant dense<0xFF800000> : vector<8xf32>
    %27 = vector.multi_reduction <maximumf>, %26, %cst_18 [1] : vector<8x16xf32> to vector<8xf32>
    %28 = vector.shape_cast %27 : vector<8xf32> to vector<8x1xf32>
    %29 = vector.broadcast %28 : vector<8x1xf32> to vector<8x16xf32>
    %30 = arith.subf %26, %29 : vector<8x16xf32>
    %31 = math.exp %30 : vector<8x16xf32>
    %32 = arith.mulf %31, %10 : vector<8x16xf32>
    %cst_19 = arith.constant dense<0.000000e+00> : vector<8xf32>
    %33 = vector.multi_reduction <add>, %32, %cst_19 [1] : vector<8x16xf32> to vector<8xf32>
    %34 = vector.shape_cast %33 : vector<8xf32> to vector<8x1xf32>
    %cst_20 = arith.constant 0.000000e+00 : f32
    %35 = vector.broadcast %cst_20 : f32 to vector<8x1xf32>
    %36 = arith.cmpf ogt, %34, %35 : vector<8x1xf32>
    %37 = tpu.reciprocal %34 {approx = true} : vector<8x1xf32> -> vector<8x1xf32>
    %cst_21 = arith.constant 0.000000e+00 : f32
    %38 = vector.broadcast %cst_21 : f32 to vector<8x1xf32>
    %39 = arith.select %36, %37, %38 : vector<8x1xi1>, vector<8x1xf32>
    %40 = vector.broadcast %39 : vector<8x1xf32> to vector<8x16xf32>
    %41 = arith.mulf %32, %40 : vector<8x16xf32>
    %cst_22 = arith.constant dense<0.000000e+00> : vector<8x8xf32>
    %42 = tpu.matmul %41, %17, %cst_22 {dimension_numbers = #tpu.dot_dimension_numbers<[1], [0], [0], [1], [0, 0, 1, 1], [], []>} : vector<8x16xf32>, vector<16x8xf32>, vector<8x8xf32> -> vector<8x8xf32>
    %43 = vector.shape_cast %41 : vector<8x16xf32> to vector<8x1x16xf32>
    %44 = arith.truncf %43 : vector<8x1x16xf32> to vector<8x1x16xbf16>
    "tpu.trace_start"() <{level = 10 : i32, message = "bqk,bkd->bqd"}> : () -> ()
    %cst_23 = arith.constant dense<0.000000e+00> : vector<8x1x8xf32>
    %45 = tpu.matmul %44, %19, %cst_23 {dimension_numbers = #tpu.dot_dimension_numbers<[2], [1], [1], [2], [0, 0, 0, 1, 1, 2], [0], [0]>} : vector<8x1x16xbf16>, vector<8x16x8xbf16>, vector<8x1x8xf32> -> vector<8x1x8xf32>
    "tpu.trace_stop"() : () -> ()
    %46 = vector.shape_cast %45 : vector<8x1x8xf32> to vector<8x8xf32>
    %47 = arith.addf %42, %46 : vector<8x8xf32>
    %48 = vector.extract_strided_slice %9 {offsets = [0, 128], sizes = [8, 8], strides = [1, 1]} : vector<8x896xf32> to vector<8x8xf32>
    %49 = vector.extract_strided_slice %5 {offsets = [0, 384], sizes = [16, 8], strides = [1, 1]} : vector<16x896xf32> to vector<16x8xf32>
    %50 = vector.extract_strided_slice %5 {offsets = [0, 640], sizes = [16, 8], strides = [1, 1]} : vector<16x896xf32> to vector<16x8xf32>
    %c1 = arith.constant 1 : index
    %c0_24 = arith.constant 0 : index
    %c0_25 = arith.constant 0 : index
    %c0_26 = arith.constant 0 : index
    %51 = vector.load %arg4[%c1, %c0_24, %c0_25, %c0_26] : memref<2x8x16x8xbf16, #tpu.memory_space<vmem>>, vector<1x8x16x8xbf16>
    %52 = vector.shape_cast %51 : vector<1x8x16x8xbf16> to vector<8x16x8xbf16>
    %cst_27 = arith.constant dense<0.000000e+00> : vector<8x16xf32>
    %53 = tpu.matmul %48, %49, %cst_27 {dimension_numbers = #tpu.dot_dimension_numbers<[1], [1], [0], [0], [0, 0, 1, 0], [], []>} : vector<8x8xf32>, vector<16x8xf32>, vector<8x16xf32> -> vector<8x16xf32>
    %54 = vector.shape_cast %48 : vector<8x8xf32> to vector<8x1x8xf32>
    %55 = arith.truncf %54 : vector<8x1x8xf32> to vector<8x1x8xbf16>
    "tpu.trace_start"() <{level = 10 : i32, message = "bqd,bkd->bqk"}> : () -> ()
    %cst_28 = arith.constant dense<0.000000e+00> : vector<8x1x16xf32>
    %56 = tpu.matmul %55, %52, %cst_28 {dimension_numbers = #tpu.dot_dimension_numbers<[2], [2], [1], [1], [0, 0, 0, 1, 1, 1], [0], [0]>} : vector<8x1x8xbf16>, vector<8x16x8xbf16>, vector<8x1x16xf32> -> vector<8x1x16xf32>
    "tpu.trace_stop"() : () -> ()
    %57 = vector.shape_cast %56 : vector<8x1x16xf32> to vector<8x16xf32>
    %58 = arith.addf %53, %57 : vector<8x16xf32>
    %59 = arith.addf %58, %14 : vector<8x16xf32>
    %cst_29 = arith.constant dense<0xFF800000> : vector<8xf32>
    %60 = vector.multi_reduction <maximumf>, %59, %cst_29 [1] : vector<8x16xf32> to vector<8xf32>
    %61 = vector.shape_cast %60 : vector<8xf32> to vector<8x1xf32>
    %62 = vector.broadcast %61 : vector<8x1xf32> to vector<8x16xf32>
    %63 = arith.subf %59, %62 : vector<8x16xf32>
    %64 = math.exp %63 : vector<8x16xf32>
    %65 = arith.mulf %64, %10 : vector<8x16xf32>
    %cst_30 = arith.constant dense<0.000000e+00> : vector<8xf32>
    %66 = vector.multi_reduction <add>, %65, %cst_30 [1] : vector<8x16xf32> to vector<8xf32>
    %67 = vector.shape_cast %66 : vector<8xf32> to vector<8x1xf32>
    %cst_31 = arith.constant 0.000000e+00 : f32
    %68 = vector.broadcast %cst_31 : f32 to vector<8x1xf32>
    %69 = arith.cmpf ogt, %67, %68 : vector<8x1xf32>
    %70 = tpu.reciprocal %67 {approx = true} : vector<8x1xf32> -> vector<8x1xf32>
    %cst_32 = arith.constant 0.000000e+00 : f32
    %71 = vector.broadcast %cst_32 : f32 to vector<8x1xf32>
    %72 = arith.select %69, %70, %71 : vector<8x1xi1>, vector<8x1xf32>
    %73 = vector.broadcast %72 : vector<8x1xf32> to vector<8x16xf32>
    %74 = arith.mulf %65, %73 : vector<8x16xf32>
    %cst_33 = arith.constant dense<0.000000e+00> : vector<8x8xf32>
    %75 = tpu.matmul %74, %50, %cst_33 {dimension_numbers = #tpu.dot_dimension_numbers<[1], [0], [0], [1], [0, 0, 1, 1], [], []>} : vector<8x16xf32>, vector<16x8xf32>, vector<8x8xf32> -> vector<8x8xf32>
    %76 = vector.shape_cast %74 : vector<8x16xf32> to vector<8x1x16xf32>
    %77 = arith.truncf %76 : vector<8x1x16xf32> to vector<8x1x16xbf16>
    "tpu.trace_start"() <{level = 10 : i32, message = "bqk,bkd->bqd"}> : () -> ()
    %cst_34 = arith.constant dense<0.000000e+00> : vector<8x1x8xf32>
    %78 = tpu.matmul %77, %52, %cst_34 {dimension_numbers = #tpu.dot_dimension_numbers<[2], [1], [1], [2], [0, 0, 0, 1, 1, 2], [0], [0]>} : vector<8x1x16xbf16>, vector<8x16x8xbf16>, vector<8x1x8xf32> -> vector<8x1x8xf32>
    "tpu.trace_stop"() : () -> ()
    %79 = vector.shape_cast %78 : vector<8x1x8xf32> to vector<8x8xf32>
    %80 = arith.addf %75, %79 : vector<8x8xf32>
    %81 = vector.extract_strided_slice %9 {offsets = [0, 768], sizes = [8, 16], strides = [1, 1]} : vector<8x896xf32> to vector<8x16xf32>
    %82 = tpu.concatenate %47, %80 in 1 : vector<8x8xf32>, vector<8x8xf32> -> vector<8x16xf32>
    %83 = arith.addf %82, %81 : vector<8x16xf32>
    %cst_35 = arith.constant 0.707106769 : f32
    %84 = vector.broadcast %cst_35 : f32 to vector<8x16xf32>
    %85 = arith.mulf %83, %84 : vector<8x16xf32>
    %86 = math.absf %85 : vector<8x16xf32>
    %cst_36 = arith.constant 0.327591091 : f32
    %87 = vector.broadcast %cst_36 : f32 to vector<8x16xf32>
    %88 = arith.mulf %87, %86 : vector<8x16xf32>
    %cst_37 = arith.constant 1.000000e+00 : f32
    %89 = vector.broadcast %cst_37 : f32 to vector<8x16xf32>
    %90 = arith.addf %89, %88 : vector<8x16xf32>
    %cst_38 = arith.constant 1.000000e+00 : f32
    %91 = vector.broadcast %cst_38 : f32 to vector<8x16xf32>
    %92 = arith.divf %91, %90 : vector<8x16xf32>
    %cst_39 = arith.constant 1.06140542 : f32
    %93 = vector.broadcast %cst_39 : f32 to vector<8x16xf32>
    %94 = arith.mulf %92, %93 : vector<8x16xf32>
    %cst_40 = arith.constant -1.45315206 : f32
    %95 = vector.broadcast %cst_40 : f32 to vector<8x16xf32>
    %96 = arith.addf %95, %94 : vector<8x16xf32>
    %97 = arith.mulf %92, %96 : vector<8x16xf32>
    %cst_41 = arith.constant 1.42141378 : f32
    %98 = vector.broadcast %cst_41 : f32 to vector<8x16xf32>
    %99 = arith.addf %98, %97 : vector<8x16xf32>
    %100 = arith.mulf %92, %99 : vector<8x16xf32>
    %cst_42 = arith.constant -0.284496725 : f32
    %101 = vector.broadcast %cst_42 : f32 to vector<8x16xf32>
    %102 = arith.addf %101, %100 : vector<8x16xf32>
    %103 = arith.mulf %92, %102 : vector<8x16xf32>
    %cst_43 = arith.constant 0.254829586 : f32
    %104 = vector.broadcast %cst_43 : f32 to vector<8x16xf32>
    %105 = arith.addf %104, %103 : vector<8x16xf32>
    %106 = arith.mulf %92, %105 : vector<8x16xf32>
    %cst_44 = arith.constant 0.000000e+00 : f32
    %107 = vector.broadcast %cst_44 : f32 to vector<8x16xf32>
    %108 = arith.subf %107, %86 : vector<8x16xf32>
    %109 = arith.mulf %108, %86 : vector<8x16xf32>
    %110 = math.exp %109 : vector<8x16xf32>
    %111 = arith.mulf %106, %110 : vector<8x16xf32>
    %cst_45 = arith.constant 1.000000e+00 : f32
    %112 = vector.broadcast %cst_45 : f32 to vector<8x16xf32>
    %113 = arith.subf %112, %111 : vector<8x16xf32>
    %cst_46 = arith.constant 0.000000e+00 : f32
    %114 = vector.broadcast %cst_46 : f32 to vector<8x16xf32>
    %115 = arith.cmpf oge, %85, %114 : vector<8x16xf32>
    %cst_47 = arith.constant 0.000000e+00 : f32
    %116 = vector.broadcast %cst_47 : f32 to vector<8x16xf32>
    %117 = arith.subf %116, %113 : vector<8x16xf32>
    %118 = arith.select %115, %113, %117 : vector<8x16xi1>, vector<8x16xf32>
    %cst_48 = arith.constant 5.000000e-01 : f32
    %119 = vector.broadcast %cst_48 : f32 to vector<8x16xf32>
    %120 = arith.mulf %119, %83 : vector<8x16xf32>
    %cst_49 = arith.constant 1.000000e+00 : f32
    %121 = vector.broadcast %cst_49 : f32 to vector<8x16xf32>
    %122 = arith.addf %121, %118 : vector<8x16xf32>
    %123 = arith.mulf %120, %122 : vector<8x16xf32>
    %cst_50 = arith.constant 0.000000e+00 : f32
    %124 = vector.broadcast %cst_50 : f32 to vector<8x112xf32>
    %125 = tpu.concatenate %123, %124 in 1 : vector<8x16xf32>, vector<8x112xf32> -> vector<8x128xf32>
    %c0_51 = arith.constant 0 : index
    %c0_52 = arith.constant 0 : index
    %126 = vector.load %arg7[%c0_51, %c0_52] : memref<8x128xf32, #tpu.memory_space<vmem>>, vector<8x128xf32>
    tpu.vector_store %arg7[%c0_51, %c0_52], %125 {strides = array<i32>} : memref<8x128xf32, #tpu.memory_space<vmem>>, vector<8x128xf32>,
    return
  }
  func.func @transform_0(%arg0: i32) -> (i32, i32) {
    %c0_i32 = arith.constant 0 : i32
    %c0_i32_0 = arith.constant 0 : i32
    %c0_i32_1 = arith.constant 0 : i32
    return %c0_i32, %c0_i32_0 : i32, i32
  }
  func.func @transform_1(%arg0: i32) -> (i32, i32) {
    %c0_i32 = arith.constant 0 : i32
    %c0_i32_0 = arith.constant 0 : i32
    return %arg0, %c0_i32 : i32, i32
  }
  func.func @transform_2(%arg0: i32) -> (i32, i32) {
    %c0_i32 = arith.constant 0 : i32
    %c0_i32_0 = arith.constant 0 : i32
    return %arg0, %c0_i32 : i32, i32
  }
  func.func @transform_3(%arg0: i32) -> (i32, i32, i32, i32) {
    %c0_i32 = arith.constant 0 : i32
    %c0_i32_0 = arith.constant 0 : i32
    %c0_i32_1 = arith.constant 0 : i32
    %c0_i32_2 = arith.constant 0 : i32
    return %c0_i32, %arg0, %c0_i32_0, %c0_i32_1 : i32, i32, i32, i32
  }
  func.func @transform_4(%arg0: i32) -> (i32, i32) {
    %c0_i32 = arith.constant 0 : i32
    %c0_i32_0 = arith.constant 0 : i32
    %c0_i32_1 = arith.constant 0 : i32
    return %c0_i32, %c0_i32_0 : i32, i32
  }
  func.func @transform_5(%arg0: i32) -> (i32, i32) {
    %c0_i32 = arith.constant 0 : i32
    %c0_i32_0 = arith.constant 0 : i32
    %c0_i32_1 = arith.constant 0 : i32
    return %c0_i32, %c0_i32_0 : i32, i32
  }
  func.func @transform_6(%arg0: i32) -> (i32, i32) {
    %c0_i32 = arith.constant 0 : i32
    %c0_i32_0 = arith.constant 0 : i32
    return %arg0, %c0_i32 : i32, i32
  }
}

</mosaic_0001>

<bundles_post_ra>
// kernel: tpu_custom_call.1
= control target key start
LH: loop header
LB: loop body
LE: loop exit
PB: predicated region body
PF: predicated region fallthrough
CT: control target
= control target key end

     0   :  { %11 = vsyncpa [#allocation4], 0  ;;  %s4576_s0 = inlined_call_operand.vmem [shape: f32[16,128], index: 0, kind: input, shape index: {}]   ;;  %s4577_s1 = inlined_call_operand.vmem [shape: f32[16,128], index: 1, kind: input, shape index: {}]   ;;  %s4578_s2 = inlined_call_operand.vmem [shape: f32[16,16], index: 2, kind: input, shape index: {}]   ;;  %s4579_s3 = inlined_call_operand.vmem [shape: bf16[2,16,16,8], index: 3, kind: input, shape index: {}]   ;;  %s4580_s4 = inlined_call_operand.hbm [shape: f32[128,896], index: 4, kind: input, shape index: {}]   ;;  %s4581_s5 = inlined_call_operand.vmem [shape: f32[1,896], index: 5, kind: input, shape index: {}]   ;;  %s4582_s6 = inlined_call_operand.hbm [shape: f32[16,128], index: 6, kind: output, shape index: {}]  }
   0x1   :  { %12 = vsyncpa [#allocation5], 0 }
   0x2   :  { %14 = vsyncpa [#allocation5 + $0x1], 0  ;;  %s3979_s21 = smov 0   ;;  %s3981_s22 = smov 0  }
   0x3   :  { %s3983_s23 = smov 0   ;;  %s3985_s24 = smov 0  }
   0x4 LB: > { %s4000_s25 = sadd.s32 4294967295, %s3934_s24   ;;  %s3318_s26 = sadd.s32 4294967294, %s3934_s24   ;;  %s3934_s24 = sphi %s3985_s24, %s4593_s24   ;;  %s3930_s23 = sphi %s3983_s23, %s4592_s23   ;;  %s3926_s22 = sphi %s3981_s22, %s4591_s22   ;;  %s3922_s21 = sphi %s3979_s21, %s4590_s21  }
   0x5   : > { %s4004_s27 = sadd.s32 1, %s3934_s24   ;;  %s100_s28 = sadd.s32 1, %s3930_s23 }
   0x6   : > { %s97_s29 = ssub.s32 %s3934_s24, %s4004_s27  ;;  %p107_p0 = scmp.ne.s32.totalorder %s3930_s23, %s3926_s22 }
   0x7   : > { %p98_p1 = scmp.eq.s32.totalorder %s97_s29, 0  ;;  %p108_p2 = scmp.eq.s32.totalorder %s3934_s24, 0 }
   0x8   : > { %p179_p3 = scmp.eq.s32.totalorder %s4000_s25, 1  ;;  %p184_p4 = scmp.ne.s32.totalorder %s3926_s22, %s3922_s21 }
   0x9   : > { %s4016_s30 = scalar_select %p98_p1, %s3930_s23, %s100_s28  }
   0xa   : > { %p4018_p5 = por %p108_p2, %p107_p0  ;;  %p4022_p6 = por %p179_p3, %p107_p0 }
   0xb   : > { %p185_p7 = scmp.eq.s32.totalorder %s3318_s26, 1  ;;  %p3319_p8 = scmp.ge.s32.totalorder %s3934_s24, 1 }
   0xc   : > { %s4585_s8 = scalar_select %p4022_p6, 1, 0 }
   0xd   : > { %p192_p9 = scmp.lt.s32.totalorder %s3934_s24, 3  ;;  %p4028_p10 = por %p185_p7, %p184_p4 }
   0xe   : > { %p3773_p11 = scmp.eq.s32.totalorder %s4000_s25, 0  ;;  %s3936_s11 = smov [#allocation3]  }
   0xf   : > { %s4586_s9 = scalar_select %p4028_p10, 1, 0 }
  0x10   : > { %p4033_p12 = pnand %p3319_p8, %p192_p9  ;;  %s207_s12 = sshll.u32 %s3936_s11, 4  ;;  %s208_s12 = int_to_ptr.vmem [resolvable:$true] %s207_s12 }
  0x11   : > { %s3855_s13 = scalar_lea.vmem %s208_s12, 14336  ;;  %p3863_p7 = scmp.lt.s32.totalorder %s208_s12, %s208_s12 }
  0x12   : > { %p3765_p13 = pneg %p4033_p12  ;;  %p3856_p2 = scmp.ne.s32.totalorder %s208_s12, %s3855_s13 }
  0x13   : > { %p3864_p10 = scmp.lt.s32.totalorder %s3855_s13, %s3855_s13 }
  0x14   : > { %p3766_p0 = pnand %p3773_p11, %p3765_p13 }
  0x15   : > { %p3865_p6 = por %p3864_p10, %p3863_p7 }
  0x16   : > { %p3846_p1 = pneg %p3766_p0 }
  0x18   : > { %p3858_p3 = pnand %p3856_p2, %p3846_p1 }
  0x1a   : > { %p3859_p4 = pneg %p3858_p3 }
  0x1c   : > { %p3866_p8 = pnand %p3865_p6, %p3859_p4 }
  0x1e   : > { %3869 = shalt.err (!%p3866_p8)
}
  0x1f   : > { %s3937_s14 = smov 896   ;;  %s3938_s15 = smov 56  }
  0x20   : > { %3768 = dma.hbm_to_vmem [thread:$0]  (!%p3766_p0), %s4580_s4, 14336, %s208_s12, [#allocation4], %s3937_s14, %s3937_s14, %s3938_s15  }
  0x21   : > { %p3321_p9 = scmp.ge.s32.totalorder %s3934_s24, 2 }
  0x23   : > { %220 = sbr.rel (%p3321_p9) target bundleno = 52 (0x34), region = 28 }
  0x28   : > { %237 = sbr.rel (!%p4018_p5) target bundleno = 52 (0x34), region = 40  ;;  %s239_s18 = sand.u32 (%p4018_p5), 1, %s3930_s23  }
  0x29   : > { %s3410_s19 = sshll.u32 (%p4018_p5), %s3934_s24, 6  ;;  %s3322_s20 = sshll.u32 (%p4018_p5), %s239_s18, 7 }
  0x2a   : > { %s4054_s29 = scalar_lea.vmem (%p4018_p5), %s4579_s3, %s3410_s19  ;;  %s241_s7 = scalar_lea.vmem (%p4018_p5), [#allocation2], %s3322_s20 }
  0x2b   : > { %v262_v0 = vld [vmem:[%s4054_s29] sm:$0xff] (%p4018_p5)   ;;  %v266_v1 = vld [vmem:[%s4054_s29 + $0x8] sm:$0xff] (%p4018_p5)   ;;  %v270_v2 = vld [vmem:[%s4054_s29 + $0x10] sm:$0xff] (%p4018_p5)  }
  0x2c   : > { %263 = vst [vmem:[%s241_s7] sm:$0xff] (%p4018_p5), %v262_v0   ;;  %267 = vst [vmem:[%s241_s7 + $0x8] sm:$0xff] (%p4018_p5), %v266_v1   ;;  %v274_v3 = vld [vmem:[%s4054_s29 + $0x18] sm:$0xff] (%p4018_p5)   ;;  %v278_v4 = vld [vmem:[%s4054_s29 + $0x20] sm:$0xff] (%p4018_p5)  }
  0x2d   : > { %271 = vst [vmem:[%s241_s7 + $0x10] sm:$0xff] %v270_v2   ;;  %v282_v5 = vld [vmem:[%s4054_s29 + $0x28] sm:$0xff]   ;;  %275 = vst [vmem:[%s241_s7 + $0x18] sm:$0xff] %v274_v3   ;;  %v286_v6 = vld [vmem:[%s4054_s29 + $0x30] sm:$0xff]  }
  0x2e   : > { %279 = vst [vmem:[%s241_s7 + $0x20] sm:$0xff] %v278_v4   ;;  %283 = vst [vmem:[%s241_s7 + $0x28] sm:$0xff] %v282_v5   ;;  %v290_v7 = vld [vmem:[%s4054_s29 + $0x38] sm:$0xff]   ;;  %v294_v8 = vld [vmem:[%s4054_s29 + $0x80] sm:$0xff]  }
  0x2f   : > { %287 = vst [vmem:[%s241_s7 + $0x30] sm:$0xff] %v286_v6   ;;  %291 = vst [vmem:[%s241_s7 + $0x38] sm:$0xff] %v290_v7   ;;  %v298_v9 = vld [vmem:[%s4054_s29 + $0x88] sm:$0xff]   ;;  %v302_v10 = vld [vmem:[%s4054_s29 + $0x90] sm:$0xff]  }
  0x30   : > { %295 = vst [vmem:[%s241_s7 + $0x40] sm:$0xff] %v294_v8   ;;  %v306_v11 = vld [vmem:[%s4054_s29 + $0x98] sm:$0xff]   ;;  %299 = vst [vmem:[%s241_s7 + $0x48] sm:$0xff] %v298_v9   ;;  %v310_v12 = vld [vmem:[%s4054_s29 + $0xa0] sm:$0xff]  }
  0x31   : > { %303 = vst [vmem:[%s241_s7 + $0x50] sm:$0xff] %v302_v10   ;;  %307 = vst [vmem:[%s241_s7 + $0x58] sm:$0xff] %v306_v11   ;;  %v314_v13 = vld [vmem:[%s4054_s29 + $0xa8] sm:$0xff]   ;;  %v318_v14 = vld [vmem:[%s4054_s29 + $0xb0] sm:$0xff]  }
  0x32   : > { %311 = vst [vmem:[%s241_s7 + $0x60] sm:$0xff] %v310_v12   ;;  %315 = vst [vmem:[%s241_s7 + $0x68] sm:$0xff] %v314_v13   ;;  %v322_v15 = vld [vmem:[%s4054_s29 + $0xb8] sm:$0xff]  }
  0x33   : > { %319 = vst [vmem:[%s241_s7 + $0x70] sm:$0xff] %v318_v14   ;;  %323 = vst [vmem:[%s241_s7 + $0x78] sm:$0xff] %v322_v15  }
  0x34 PF: > { %416 = sbr.rel (%p4033_p12) target bundleno = 1870 (0x74e), region = 81  ;;  %s4075_s11 = sand.u32 (!%p4033_p12), 1, %s3926_s22  }
  0x35   : > { %s3327_s12 = sshll.u32 (!%p4033_p12), %s4075_s11, 7 }
  0x36   : > { %s4078_s13 = scalar_lea.vmem (!%p4033_p12), [#allocation2], %s3327_s12 }
  0x39   : > { %3913 = dma.done.wait (%p3773_p11), [#allocation4], 14336  }
  0x3a   : > { %3915 = vsyncadd (%p3773_p11), [#allocation4], 4294952960  ;;  %v3939_v16 = vmov 0.0   ;;  %v578_v17 = vld [vmem:[#allocation3 + $0x360] sm:$0xff]  ;;  %v577_v18 = vld [vmem:[#allocation3 + $0x358] sm:$0xff]  ;;  %p460_p5 = scmp.lt.s32.totalorder %s4000_s25, 1 }
  0x3b   : > { %670 = vmatprep.mubr.f32.mxu0 %v3939_v16  ;;  %747 = vmatprep.mubr.f32.mxu1 %v3939_v16  ;;  %v571_v19 = vld [vmem:[#allocation3 + $0x328] sm:$0xff]  ;;  %v570_v20 = vld [vmem:[#allocation3 + $0x320] sm:$0xff]  ;;  %v564_v21 = vld [vmem:[#allocation3 + $0x2f0] sm:$0xff]  ;;  %vm1007_vm0 = vcmask 64512   ;;  %vm3940_vm1 = vmmov 0   ;;  %vm1420_vm2 = vcmask 1041409  }
  0x3c   : > { %606 = vmatprep.subr.mxu0 %v578_v17  ;;  %v563_v22 = vld [vmem:[#allocation3 + $0x2e8] sm:$0xff]  ;;  %v557_v23 = vld [vmem:[#allocation3 + $0x2b8] sm:$0xff]  ;;  %v556_v24 = vld [vmem:[#allocation3 + $0x2b0] sm:$0xff]  ;;  %s4104_s17 = scalar_select %p460_p5, %s4000_s25, 1  ;;  %vm1423_vm3 = vcmask 1042434   ;;  %vm1426_vm4 = vcmask 1043459  }
  0x3d   : > { %607 = vmatpush1.msra.mxu0 %v577_v18  ;;  %v550_v25 = vld [vmem:[#allocation3 + $0x280] sm:$0xff]  ;;  %v549_v26 = vld [vmem:[#allocation3 + $0x278] sm:$0xff]  ;;  %v543_v27 = vld [vmem:[#allocation3 + $0x248] sm:$0xff]  ;;  %vm1429_vm5 = vcmask 1044484   ;;  %vm1432_vm6 = vcmask 1045509   ;;  %vm1435_vm7 = vcmask 1046534  }
  0x3e   : > { %608 = vmatprep.subr.mxu0 %v571_v19  ;;  %v542_v28 = vld [vmem:[#allocation3 + $0x240] sm:$0xff]  ;;  %v536_v29 = vld [vmem:[#allocation3 + $0x210] sm:$0xff]  ;;  %v535_v30 = vld [vmem:[#allocation3 + $0x208] sm:$0xff]  ;;  %s3330_s18 = sshll.u32 %s4104_s17, 3  ;;  %vm1438_vm8 = vcmask 1047559   ;;  %vm1520_vm9 = vcmask 130048  }
  0x3f   : > { %609 = vmatpush1.msra.mxu0 %v570_v20  ;;  %v529_v31 = vld [vmem:[#allocation3 + $0x1d8] sm:$0xff]  ;;  %v528_v32 = vld [vmem:[#allocation3 + $0x1d0] sm:$0xff]  ;;  %v522_v33 = vld [vmem:[#allocation3 + $0x1a0] sm:$0xff]  ;;  %s463_s26 = scalar_lea.vmem %s4577_s1, %s3330_s18  ;;  %s467_s10 = scalar_lea.vmem %s4578_s2, %s3330_s18 }
  0x40   : > { %610 = vmatprep.subr.mxu0 %v564_v21  ;;  %v521_v34 = vld [vmem:[#allocation3 + $0x198] sm:$0xff]  ;;  %v515_v35 = vld [vmem:[#allocation3 + $0x168] sm:$0xff]  ;;  %v514_v36 = vld [vmem:[#allocation3 + $0x160] sm:$0xff]  ;;  %s3329_s16 = sshll.u32 %s4075_s11, 3  ;;  %s3406_s17 = sshll.u32 %s4000_s25, 7 }
  0x41   : > { %611 = vmatpush1.msra.mxu0 %v563_v22  ;;  %v508_v37 = vld [vmem:[#allocation3 + $0x130] sm:$0xff]  ;;  %v507_v38 = vld [vmem:[#allocation3 + $0x128] sm:$0xff]  ;;  %v501_v39 = vld [vmem:[#allocation3 + $0xf8] sm:$0xff]  ;;  %s459_s18 = scalar_lea.vmem [#allocation6], %s3329_s16  ;;  %s4538_s28 = scalar_lea.hbm %s4582_s6, %s3406_s17 }
  0x42   : > { %612 = vmatprep.subr.mxu0 %v557_v23  ;;  %v500_v40 = vld [vmem:[#allocation3 + $0xf0] sm:$0xff]  ;;  %v494_v41 = vld [vmem:[#allocation3 + $0xc0] sm:$0xff]  ;;  %v579_v43 = vld [vmem:[#allocation3 + $0x368] sm:$0xff]  ;;  %s3217_s19 = sshll.u32 %s459_s18, 4  ;;  %s3204_s29 = scalar_lea.sflag [#allocation5], %s4075_s11  ;;  %s3218_s19 = int_to_ptr.vmem [resolvable:$true] %s3217_s19 }
  0x43   : > { %613 = vmatpush1.msra.mxu0 %v556_v24  ;;  %v580_v42 = vld [vmem:[#allocation3 + $0x370] sm:$0xff]  ;;  %v493_v44 = vld [vmem:[#allocation3 + $0xb8] sm:$0xff]  ;;  %v487_v47 = vld [vmem:[#allocation3 + $0x88] sm:$0xff]  ;;  %s3870_s7 = scalar_lea.vmem %s3218_s19, 128  ;;  %p4588_p10 = scmp.ne.s32.totalorder %s4585_s8, 0 }
  0x44   : > { %614 = vmatprep.subr.mxu0 %v550_v25  ;;  %683 = vmatprep.subr.mxu1 %v580_v42  ;;  %v573_v45 = vld [vmem:[#allocation3 + $0x338] sm:$0xff]  ;;  %v572_v46 = vld [vmem:[#allocation3 + $0x330] sm:$0xff]  ;;  %v566_v48 = vld [vmem:[#allocation3 + $0x300] sm:$0xff]  ;;  %p3871_p6 = scmp.ne.s32.totalorder %s3218_s19, %s3870_s7  ;;  %s3943_s12 = smov [#allocation6]  }
  0x45   : > { %615 = vmatpush1.msra.mxu0 %v549_v26  ;;  %684 = vmatpush1.msra.mxu1 %v579_v43  ;;  %v486_v49 = vld [vmem:[#allocation3 + $0x80] sm:$0xff]  ;;  %v565_v50 = vld [vmem:[#allocation3 + $0x2f8] sm:$0xff]  ;;  %v480_v51 = vld [vmem:[#allocation3 + $0x50] sm:$0xff]  ;;  %s3874_s25 = sshll.u32 %s3943_s12, 4  ;;  %s3875_s25 = int_to_ptr.vmem [resolvable:$false] %s3874_s25 }
  0x46   : > { %616 = vmatprep.subr.mxu0 %v543_v27  ;;  %685 = vmatprep.subr.mxu1 %v573_v45  ;;  %v559_v52 = vld [vmem:[#allocation3 + $0x2c8] sm:$0xff]  ;;  %v558_v54 = vld [vmem:[#allocation3 + $0x2c0] sm:$0xff]  ;;  %v473_v55 = vld [vmem:[#allocation3 + $0x18] sm:$0xff]  ;;  %p3872_p11 = pnand %p3871_p6, %p4588_p10  ;;  %p3877_p13 = scmp.lt.s32.totalorder %s3218_s19, %s3875_s25 }
  0x47   : > { %617 = vmatpush1.msra.mxu0 %v542_v28  ;;  %686 = vmatpush1.msra.mxu1 %v572_v46  ;;  %v479_v53 = vld [vmem:[#allocation3 + $0x48] sm:$0xff]  ;;  %v552_v56 = vld [vmem:[#allocation3 + $0x290] sm:$0xff]  ;;  %v4089_v59 = vld [vmem:[%s4576_s0] sm:$0xff] }
  0x48   : > { %618 = vmatprep.subr.mxu0 %v536_v29  ;;  %687 = vmatprep.subr.mxu1 %v566_v48  ;;  %v472_v57 = vld [vmem:[#allocation3 + $0x10] sm:$0xff]  ;;  %v551_v58 = vld [vmem:[#allocation3 + $0x288] sm:$0xff]  ;;  %v569_v62 = vld [vmem:[#allocation3 + $0x318] sm:$0xff]  ;;  %p3873_p12 = pneg %p3872_p11 }
  0x49   : > { %619 = vmatpush1.msra.mxu0 %v535_v30  ;;  %688 = vmatpush1.msra.mxu1 %v565_v50  ;;  %v576_v60 = vld [vmem:[#allocation3 + $0x350] sm:$0xff]  ;;  %v575_v61 = vld [vmem:[#allocation3 + $0x348] sm:$0xff]  ;;  %v545_v0 = vld [vmem:[#allocation3 + $0x258] sm:$0xff] }
  0x4a   : > { %620 = vmatprep.subr.mxu0 %v529_v31  ;;  %689 = vmatprep.subr.mxu1 %v559_v52  ;;  %v568_v63 = vld [vmem:[#allocation3 + $0x310] sm:$0xff]  ;;  %v562_v1 = vld [vmem:[#allocation3 + $0x2e0] sm:$0xff]  ;;  %v4094_v2 = vld [vmem:[%s4576_s0 + $0x8] sm:$0xff] }
  0x4b   : > { %621 = vmatpush1.msra.mxu0 %v528_v32  ;;  %690 = vmatpush1.msra.mxu1 %v558_v54  ;;  %v544_v3 = vld [vmem:[#allocation3 + $0x250] sm:$0xff]  ;;  %v561_v4 = vld [vmem:[#allocation3 + $0x2d8] sm:$0xff]  ;;  %v555_v5 = vld [vmem:[#allocation3 + $0x2a8] sm:$0xff] }
  0x4c   : > { %622 = vmatprep.subr.mxu0 %v522_v33  ;;  %691 = vmatprep.subr.mxu1 %v552_v56  ;;  %v538_v6 = vld [vmem:[#allocation3 + $0x220] sm:$0xff]  ;;  %v537_v8 = vld [vmem:[#allocation3 + $0x218] sm:$0xff]  ;;  %v548_v9 = vld [vmem:[#allocation3 + $0x270] sm:$0xff] }
  0x4d   : > { %623 = vmatpush1.msra.mxu0 %v521_v34  ;;  %692 = vmatpush1.msra.mxu1 %v551_v58  ;;  %v554_v7 = vld [vmem:[#allocation3 + $0x2a0] sm:$0xff]  ;;  %v531_v10 = vld [vmem:[#allocation3 + $0x1e8] sm:$0xff]  ;;  %v541_v13 = vld [vmem:[#allocation3 + $0x238] sm:$0xff] }
  0x4e   : > { %624 = vmatprep.subr.mxu0 %v515_v35  ;;  %693 = vmatprep.subr.mxu1 %v545_v0  ;;  %v547_v11 = vld [vmem:[#allocation3 + $0x268] sm:$0xff]  ;;  %v530_v12 = vld [vmem:[#allocation3 + $0x1e0] sm:$0xff]  ;;  %v524_v14 = vld [vmem:[#allocation3 + $0x1b0] sm:$0xff] }
  0x4f   : > { %625 = vmatpush1.msra.mxu0 %v514_v36  ;;  %694 = vmatpush1.msra.mxu1 %v544_v3  ;;  %v540_v15 = vld [vmem:[#allocation3 + $0x230] sm:$0xff]  ;;  %v523_v17 = vld [vmem:[#allocation3 + $0x1a8] sm:$0xff]  ;;  %v534_v18 = vld [vmem:[#allocation3 + $0x200] sm:$0xff] }
  0x50   : > { %626 = vmatprep.subr.mxu0 %v508_v37  ;;  %695 = vmatprep.subr.mxu1 %v538_v6  ;;  %v517_v19 = vld [vmem:[#allocation3 + $0x178] sm:$0xff]  ;;  %v516_v21 = vld [vmem:[#allocation3 + $0x170] sm:$0xff]  ;;  %v527_v22 = vld [vmem:[#allocation3 + $0x1c8] sm:$0xff] }
  0x51   : > { %627 = vmatpush1.msra.mxu0 %v507_v38  ;;  %696 = vmatpush1.msra.mxu1 %v537_v8  ;;  %v533_v20 = vld [vmem:[#allocation3 + $0x1f8] sm:$0xff]  ;;  %v510_v23 = vld [vmem:[#allocation3 + $0x140] sm:$0xff]  ;;  %v520_v26 = vld [vmem:[#allocation3 + $0x190] sm:$0xff] }
  0x52   : > { %628 = vmatprep.subr.mxu0 %v501_v39  ;;  %697 = vmatprep.subr.mxu1 %v531_v10  ;;  %v526_v24 = vld [vmem:[#allocation3 + $0x1c0] sm:$0xff]  ;;  %v509_v25 = vld [vmem:[#allocation3 + $0x138] sm:$0xff]  ;;  %v503_v27 = vld [vmem:[#allocation3 + $0x108] sm:$0xff] }
  0x53   : > { %629 = vmatpush1.msra.mxu0 %v500_v40  ;;  %698 = vmatpush1.msra.mxu1 %v530_v12  ;;  %v519_v28 = vld [vmem:[#allocation3 + $0x188] sm:$0xff]  ;;  %v502_v29 = vld [vmem:[#allocation3 + $0x100] sm:$0xff]  ;;  %v513_v30 = vld [vmem:[#allocation3 + $0x158] sm:$0xff]  ;;  %v3941_v12 = vmov 1966171168  }
  0x54   : > { %630 = vmatprep.subr.mxu0 %v494_v41  ;;  %699 = vmatprep.subr.mxu1 %v524_v14  ;;  %v496_v31 = vld [vmem:[#allocation3 + $0xd0] sm:$0xff]  ;;  %v495_v33 = vld [vmem:[#allocation3 + $0xc8] sm:$0xff]  ;;  %v506_v34 = vld [vmem:[#allocation3 + $0x120] sm:$0xff] }
  0x55   : > { %631 = vmatpush1.msra.mxu0 %v493_v44  ;;  %700 = vmatpush1.msra.mxu1 %v523_v17  ;;  %v512_v32 = vld [vmem:[#allocation3 + $0x150] sm:$0xff]  ;;  %v489_v35 = vld [vmem:[#allocation3 + $0x98] sm:$0xff]  ;;  %v499_v38 = vld [vmem:[#allocation3 + $0xe8] sm:$0xff] }
  0x56   : > { %632 = vmatprep.subr.mxu0 %v487_v47  ;;  %701 = vmatprep.subr.mxu1 %v517_v19  ;;  %v505_v36 = vld [vmem:[#allocation3 + $0x118] sm:$0xff]  ;;  %v488_v37 = vld [vmem:[#allocation3 + $0x90] sm:$0xff]  ;;  %v482_v39 = vld [vmem:[#allocation3 + $0x60] sm:$0xff] }
  0x57   : > { %633 = vmatpush1.msra.mxu0 %v486_v49  ;;  %702 = vmatpush1.msra.mxu1 %v516_v21  ;;  %v498_v40 = vld [vmem:[#allocation3 + $0xe0] sm:$0xff]  ;;  %v492_v41 = vld [vmem:[#allocation3 + $0xb0] sm:$0xff]  ;;  %v491_v42 = vld [vmem:[#allocation3 + $0xa8] sm:$0xff] }
  0x58   : > { %634 = vmatprep.subr.mxu0 %v480_v51  ;;  %703 = vmatprep.subr.mxu1 %v510_v23  ;;  %v485_v43 = vld [vmem:[#allocation3 + $0x78] sm:$0xff]  ;;  %v484_v44 = vld [vmem:[#allocation3 + $0x70] sm:$0xff]  ;;  %v478_v45 = vld [vmem:[#allocation3 + $0x40] sm:$0xff] }
  0x59   : > { %635 = vmatpush1.msra.mxu0 %v479_v53  ;;  %704 = vmatpush1.msra.mxu1 %v509_v25  ;;  %v477_v46 = vld [vmem:[#allocation3 + $0x38] sm:$0xff]  ;;  %v471_v47 = vld [vmem:[#allocation3 + $0x8] sm:$0xff]  ;;  %v470_v48 = vld [vmem:[#allocation3] sm:$0xff] }
  0x5a   : > { %636 = vmatprep.subr.mxu0 %v473_v55  ;;  %705 = vmatprep.subr.mxu1 %v503_v27  ;;  %v4112_v49 = vld [vmem:[%s463_s26] sm:$0xff]  ;;  %v481_v50 = vld [vmem:[#allocation3 + $0x58] sm:$0xff]  ;;  %v475_v51 = vld [vmem:[#allocation3 + $0x28] sm:$0xff] }
  0x5b   : > { %637 = vmatpush1.msra.mxu0 %v472_v57  ;;  %706 = vmatpush1.msra.mxu1 %v502_v29  ;;  %v474_v52 = vld [vmem:[#allocation3 + $0x20] sm:$0xff]  ;;  %v581_v53 = vld [vmem:[#allocation3 + $0x378] sm:$0xff]  ;;  %v567_v55 = vld [vmem:[#allocation3 + $0x308] sm:$0xff] }
  0x5c   : > { %671 = vmatmul.mubr.f32.vlgmr.msra.gmra.mxu0 %v4089_v59  ;;  %776 = vmatprep.subr.mxu0 %v576_v60  ;;  %v574_v54 = vld [vmem:[#allocation3 + $0x340] sm:$0xff]  ;;  %v560_v56 = vld [vmem:[#allocation3 + $0x2d0] sm:$0xff]  ;;  %v553_v57 = vld [vmem:[#allocation3 + $0x298] sm:$0xff] }
  0x5d   : > { %777 = vmatpush1.msra.mxu0 %v575_v61  ;;  %676 = vmatprep.mubr.f32.mxu0 %v3939_v16  ;;  %v546_v58 = vld [vmem:[#allocation3 + $0x260] sm:$0xff]  ;;  %v532_v60 = vld [vmem:[#allocation3 + $0x1f0] sm:$0xff]  ;;  %v525_v61 = vld [vmem:[#allocation3 + $0x1b8] sm:$0xff] }
  0x5e   : > { %778 = vmatprep.subr.mxu0 %v569_v62  ;;  %707 = vmatprep.subr.mxu1 %v496_v31  ;;  %v518_v62 = vld [vmem:[#allocation3 + $0x180] sm:$0xff]  ;;  %v504_v0 = vld [vmem:[#allocation3 + $0x110] sm:$0xff]  ;;  %v4184_v29 = vld [vmem:[%s4078_s13 + $0x18] sm:$0xff]  }
  0x5f   : > { %779 = vmatpush1.msra.mxu0 %v568_v63  ;;  %708 = vmatpush1.msra.mxu1 %v495_v33  ;;  %v511_v63 = vld [vmem:[#allocation3 + $0x148] sm:$0xff]  ;;  %v4135_v3 = vld [vmem:[%s4078_s13] sm:$0xff]   ;;  %v476_v6 = vld [vmem:[#allocation3 + $0x30] sm:$0xff] }
  0x60   : > { %780 = vmatprep.subr.mxu0 %v562_v1  ;;  %677 = vmatmul.mubr.f32.gmra.mxu0 %v4094_v2  ;;  %v497_v1 = vld [vmem:[#allocation3 + $0xd8] sm:$0xff]  ;;  %v4167_v19 = vld [vmem:[%s4581_s5] sm:$0xff] }
  0x61   : > { %781 = vmatpush1.msra.mxu0 %v561_v4  ;;  %840 = vmatprep.mubr.f32.mxu0 %v3939_v16  ;;  %v483_v4 = vld [vmem:[#allocation3 + $0x68] sm:$0xff] }
  0x62   : > { %782 = vmatprep.subr.mxu0 %v555_v5  ;;  %709 = vmatprep.subr.mxu1 %v489_v35  ;;  %v1012_v5 = vsel %vm1007_vm0, %v4135_v3, 0  ;;  %v1165_v35 = vsel %vm1007_vm0, %v4184_v29, 0 }
  0x63   : > { %783 = vmatpush1.msra.mxu0 %v554_v7  ;;  %710 = vmatpush1.msra.mxu1 %v488_v37  ;;  %v4142_v7 = vld [vmem:[%s4078_s13 + $0x8] sm:$0xff]   ;;  %v4196_v37 = vld [vmem:[%s4078_s13 + $0x20] sm:$0xff]  }
  0x64   : > { %784 = vmatprep.subr.mxu0 %v548_v9  ;;  %711 = vmatprep.subr.mxu1 %v482_v39  ;;  %v1063_v8 = vsel %vm1007_vm0, %v4142_v7, 0  ;;  %v586_v9 = vlaneseq }
  0x65   : > { %785 = vmatpush1.msra.mxu0 %v547_v11  ;;  %712 = vmatpush1.msra.mxu1 %v481_v50 }
  0x66   : > { %786 = vmatprep.subr.mxu0 %v541_v13  ;;  %713 = vmatprep.subr.mxu1 %v475_v51  ;;  %v4157_v11 = vshrl.u32 %v586_v9, 7  ;;  %v939_v13 = vunpack.c.l.s4 %v3941_v12 }
  0x67   : > { %787 = vmatpush1.msra.mxu0 %v540_v15  ;;  %714 = vmatpush1.msra.mxu1 %v474_v52 }
  0x68   : > { %788 = vmatprep.subr.mxu0 %v534_v18  ;;  %3504 = vmatprep.subr.mxu1 %v3939_v16  ;;  %v763_v15 = vsub.s32 0, %v4157_v11  ;;  %v940_v18 = vunpack.c.0.s8 %v939_v13 }
  0x69   : > { %789 = vmatpush1.msra.mxu0 %v533_v20  ;;  %748 = vmatmul.mubr.f32.vlgmr.msra.gmra.mxu1 %v4089_v59  ;;  %v539_v59 = vld [vmem:[#allocation3 + $0x228] sm:$0xff] }
  0x6a   : > { %790 = vmatprep.subr.mxu0 %v527_v22  ;;  %3505 = vmatpush3.msra.mxu1 %v581_v53  ;;  %v764_v20 = vrot.slane %v4167_v19, %v763_v15  ;;  %v4173_v22 = vsub.s32 %v940_v18, %v4157_v11 }
  0x6b   : > { %791 = vmatpush1.msra.mxu0 %v526_v24  ;;  %753 = vmatprep.mubr.f32.mxu1 %v3939_v16 }
  0x6c   : > { %792 = vmatprep.subr.mxu0 %v520_v26  ;;  %3506 = vmatprep.subr.mxu1 %v3939_v16  ;;  %v4180_v26 = vld [vmem:[%s4078_s13 + $0x10] sm:$0xff]  }
  0x6d   : > { %793 = vmatpush1.msra.mxu0 %v519_v28  ;;  %3507 = vmatpush3.msra.mxu1 %v574_v54  ;;  %v588_v54 = vsub.s32 2, %v4157_v11 }
  0x6e   : > { %794 = vmatprep.subr.mxu0 %v513_v30  ;;  %3508 = vmatprep.subr.mxu1 %v3939_v16 }
  0x6f   : > { %795 = vmatpush1.msra.mxu0 %v512_v32  ;;  %754 = vmatmul.mubr.f32.gmra.mxu1 %v4094_v2  ;;  %v490_v2 = vld [vmem:[#allocation3 + $0xa0] sm:$0xff]  ;;  %v1114_v32 = vsel %vm1007_vm0, %v4180_v26, 0 }
  0x70   : > { %796 = vmatprep.subr.mxu0 %v506_v34  ;;  %3509 = vmatpush3.msra.mxu1 %v567_v55 }
  0x71   : > { %797 = vmatpush1.msra.mxu0 %v505_v36  ;;  %3510 = vmatprep.subr.mxu1 %v3939_v16 }
  0x72   : > { %798 = vmatprep.subr.mxu0 %v499_v38  ;;  %3511 = vmatpush3.msra.mxu1 %v560_v56 }
  0x73   : > { %799 = vmatpush1.msra.mxu0 %v498_v40  ;;  %3512 = vmatprep.subr.mxu1 %v3939_v16  ;;  %v4205_v40 = vld [vmem:[%s4078_s13 + $0x28] sm:$0xff]  }
  0x74   : > { %800 = vmatprep.subr.mxu0 %v492_v41  ;;  %3513 = vmatpush3.msra.mxu1 %v553_v57  ;;  %v589_v57 = vrot.slane %v4167_v19, %v588_v54 }
  0x75   : > { %801 = vmatpush1.msra.mxu0 %v491_v42  ;;  %3514 = vmatprep.subr.mxu1 %v3939_v16  ;;  %v1216_v42 = vsel %vm1007_vm0, %v4196_v37, 0 }
  0x76   : > { %802 = vmatprep.subr.mxu0 %v485_v43  ;;  %3515 = vmatpush3.msra.mxu1 %v546_v58 }
  0x77   : > { %803 = vmatpush1.msra.mxu0 %v484_v44  ;;  %3516 = vmatprep.subr.mxu1 %v3939_v16 }
  0x78   : > { %804 = vmatprep.subr.mxu0 %v478_v45  ;;  %3517 = vmatpush3.msra.mxu1 %v539_v59  ;;  %v1267_v45 = vsel %vm1007_vm0, %v4205_v40, 0 }
  0x79   : > { %805 = vmatpush1.msra.mxu0 %v477_v46  ;;  %3518 = vmatprep.subr.mxu1 %v3939_v16 }
  0x7a   : > { %806 = vmatprep.subr.mxu0 %v471_v47  ;;  %3519 = vmatpush3.msra.mxu1 %v532_v60  ;;  %v4219_v47 = vld [vmem:[%s4078_s13 + $0x30] sm:$0xff]  }
  0x7b   : > { %807 = vmatpush1.msra.mxu0 %v470_v48  ;;  %3520 = vmatprep.subr.mxu1 %v3939_v16  ;;  %v1318_v51 = vsel %vm1007_vm0, %v4219_v47, 0 }
  0x7c   : > { %841 = vmatmul.mubr.f32.vlgmr.msra.gmra.mxu0 %v4112_v49  ;;  %3539 = vmatprep.subr.bf16.mxu0 %v3939_v16 }
  0x7d   : > { %3521 = vmatpush3.msra.mxu1 %v525_v61  ;;  %3540 = vmatpush3.bf16.xpose.msra.mxu0 %v1012_v5 }
  0x7e   : > { %3522 = vmatprep.subr.mxu1 %v3939_v16  ;;  %3551 = vmatprep.subr.bf16.mxu0 %v3939_v16 }
  0x7f   : > { %3523 = vmatpush3.msra.mxu1 %v518_v62  ;;  %3536 = vmatprep.mubr.msk.f32.mxu1 %vm3940_vm1, %v3939_v16 }
  0x80   : > { %3524 = vmatprep.subr.mxu1 %v3939_v16  ;;  %3541 = vmatprep.mubr.msk.bf16.mxu0 %vm3940_vm1, %v3939_v16 }
  0x81   : > { %3525 = vmatpush3.msra.mxu1 %v511_v63 }
  0x82   : > { %3526 = vmatprep.subr.mxu1 %v3939_v16 }
  0x83   : > { %3527 = vmatpush3.msra.mxu1 %v504_v0 }
  0x84   : > { %3528 = vmatprep.subr.mxu1 %v3939_v16 }
  0x85   : > { %3529 = vmatpush3.msra.mxu1 %v497_v1 }
  0x86   : > { %3530 = vmatprep.subr.mxu1 %v3939_v16 }
  0x87   : > { %3531 = vmatpush3.msra.mxu1 %v490_v2 }
  0x88   : > { %3532 = vmatprep.subr.mxu1 %v3939_v16 }
  0x89   : > { %3533 = vmatpush3.msra.mxu1 %v483_v4 }
  0x8a   : > { %3534 = vmatprep.subr.mxu1 %v3939_v16 }
  0x8b   : > { %3535 = vmatpush3.msra.mxu1 %v476_v6 }
  0x8c   : > { %3545 = vmatprep.subr.bf16.mxu1 %v3939_v16  ;;  %3537 = vmatmul.mubr.f32.vlgmr.msra.gmra.mxu1 %v4112_v49  ;;  %v4226_v49 = vld [vmem:[%s4078_s13 + $0x38] sm:$0xff]  }
  0x8d   : > { %3546 = vmatpush3.bf16.xpose.msra.mxu1 %v1063_v8  ;;  %3547 = vmatprep.mubr.msk.bf16.mxu1 %vm3940_vm1, %v3939_v16  ;;  %v1369_v53 = vsel %vm1007_vm0, %v4226_v49, 0 }
  0x8e   : > { %3557 = vmatprep.subr.bf16.mxu1 %v3939_v16 }
 0x11c   : > { %v4155_v10 = vpop.f32.mrf.mxu0 }
 0x11d   : > { %v673_v61 = vadd.f32 %v4155_v10, %v589_v57 }
 0x11e   : > { %v4159_v14 = vpop.f32.mrf.mxu0 }
 0x120   : > { %v4162_v17 = vpop.f32.mrf.mxu0 }
 0x121   : > { %v679_v59 = vadd.f32 %v4162_v17, %v589_v57 }
 0x122   : > { %v4170_v21 = vpop.f32.mrf.mxu0 }
 0x129   : > { %v4262_v62 = vpop.f32.mrf.mxu1 }
 0x12b   : > { %v4264_v63 = vpop.f32.mrf.mxu1 }
 0x12f   : > { %v4266_v0 = vpop.f32.mrf.mxu1 }
 0x131   : > { %v4268_v1 = vpop.f32.mrf.mxu1 }
 0x13c   : > { %v842_v23 = vpop.f32.mrf.mxu0 }
 0x13d   : > { %v4175_v24 = vadd.f32 %v842_v23, %v764_v20 }
 0x13e   : > { %v4272_v4 = vpop.f32.mrf.mxu0 }
 0x13f   : > { %v944_v25 = vrot.slane %v4175_v24, %v4173_v22  ;;  %v937_v34 = vcombine.high %v4175_v24, %v4175_v24 }
 0x141   : > { %v952_v27 = vcombine.high %v944_v25, %v944_v25  ;;  %v960_v28 = vrot.slane %v944_v25, %v4173_v22  ;;  %v951_v38 = vrot.slane %v937_v34, %v4173_v22 }
 0x143   : > { %v974_v30 = vrot.slane %v952_v27, %v4173_v22  ;;  %v994_v31 = vpack.c.bf16 %v960_v28, %v960_v28  ;;  %v982_v36 = vcombine.high %v960_v28, %v960_v28  ;;  %v953_v43 = vcombine.high %v951_v38, %v951_v38 }
 0x144   : > { %v967_v46 = vrot.slane %v951_v38, %v4173_v22 }
 0x145   : > { %v995_v33 = vpack.c.bf16 %v974_v30, %v974_v30  ;;  %3542 = vmatmul.mubr.msk.bf16.vlgmr.msra.gmra.mxu0 %vm1007_vm0, %v994_v31  ;;  %v984_v39 = vcombine.high %v974_v30, %v974_v30  ;;  %v996_v41 = vpack.c.bf16 %v982_v36, %v982_v36  ;;  %v981_v48 = vrot.slane %v953_v43, %v4173_v22 }
 0x146   : > { %3552 = vmatpush3.bf16.xpose.msra.mxu0 %v1114_v32  ;;  %3553 = vmatprep.mubr.msk.bf16.mxu0 %vm3940_vm1, %v3939_v16  ;;  %v998_v50 = vpack.c.bf16 %v967_v46, %v967_v46  ;;  %v983_v55 = vcombine.high %v967_v46, %v967_v46 }
 0x147   : > { %3548 = vmatmul.mubr.msk.bf16.vlgmr.msra.gmra.mxu1 %vm1007_vm0, %v995_v33  ;;  %3563 = vmatprep.subr.bf16.mxu0 %v3939_v16  ;;  %v997_v44 = vpack.c.bf16 %v984_v39, %v984_v39  ;;  %v999_v52 = vpack.c.bf16 %v981_v48, %v981_v48  ;;  %v985_v56 = vcombine.high %v981_v48, %v981_v48 }
 0x148   : > { %3558 = vmatpush3.bf16.xpose.msra.mxu1 %v1165_v35  ;;  %3559 = vmatprep.mubr.msk.bf16.mxu1 %vm3940_vm1, %v3939_v16  ;;  %v1000_v58 = vpack.c.bf16 %v983_v55, %v983_v55 }
 0x149   : > { %3569 = vmatprep.subr.bf16.mxu1 %v3939_v16  ;;  %v1001_v60 = vpack.c.bf16 %v985_v56, %v985_v56 }
 0x14c   : > { %v4270_v2 = vpop.f32.mrf.mxu1 }
 0x14d   : > { %3554 = vmatmul.mubr.msk.bf16.vlgmr.msra.gmra.mxu0 %vm1007_vm0, %v996_v41 }
 0x14e   : > { %3564 = vmatpush3.bf16.xpose.msra.mxu0 %v1216_v42  ;;  %3565 = vmatprep.mubr.msk.bf16.mxu0 %vm3940_vm1, %v3939_v16 }
 0x14f   : > { %3560 = vmatmul.mubr.msk.bf16.vlgmr.msra.gmra.mxu1 %vm1007_vm0, %v997_v44  ;;  %3575 = vmatprep.subr.bf16.mxu0 %v3939_v16 }
 0x150   : > { %3570 = vmatpush3.bf16.xpose.msra.mxu1 %v1267_v45  ;;  %3571 = vmatprep.mubr.msk.bf16.mxu1 %vm3940_vm1, %v3939_v16 }
 0x151   : > { %3581 = vmatprep.subr.bf16.mxu1 %v3939_v16 }
 0x155   : > { %3566 = vmatmul.mubr.msk.bf16.vlgmr.msra.gmra.mxu0 %vm1007_vm0, %v998_v50  ;;  %v4282_v50 = vld [vmem:[%s467_s10] sm:$0xff]  ;;  %s3876_s10 = scalar_lea.vmem %s3875_s25, 256 }
 0x156   : > { %3576 = vmatpush3.bf16.xpose.msra.mxu0 %v1318_v51  ;;  %3577 = vmatprep.mubr.msk.bf16.mxu0 %vm3940_vm1, %v3939_v16  ;;  %v3332_v55 = vadd.f32 -1.0, %v4282_v50  ;;  %p3878_p0 = scmp.lt.s32.totalorder %s3876_s10, %s3870_s7 }
 0x157   : > { %3572 = vmatmul.mubr.msk.bf16.vlgmr.msra.gmra.mxu1 %vm1007_vm0, %v999_v52  ;;  %3587 = vmatprep.subr.mxu0 %v3939_v16 }
 0x158   : > { %3582 = vmatpush3.bf16.xpose.msra.mxu1 %v1369_v53  ;;  %3583 = vmatprep.mubr.msk.bf16.mxu1 %vm3940_vm1, %v3939_v16  ;;  %p3879_p1 = por %p3878_p0, %p3877_p13 }
 0x159   : > { %3594 = vmatprep.subr.bf16.mxu1 %v3939_v16 }
 0x15a   : > { %p3880_p2 = pnand %p3879_p1, %p3873_p12 }
 0x15d   : > { %3578 = vmatmul.mubr.msk.bf16.vlgmr.msra.gmra.mxu0 %vm1007_vm0, %v1000_v58 }
 0x15e   : > { %3588 = vmatpush3.xpose.msk.msra.mxu0 %vm1007_vm0, %v679_v59  ;;  %3591 = vmatprep.mubr.msk.f32.mxu0 %vm3940_vm1, %v3939_v16 }
 0x15f   : > { %3584 = vmatmul.mubr.msk.bf16.vlgmr.msra.gmra.mxu1 %vm1007_vm0, %v1001_v60  ;;  %3589 = vmatprep.subr.mxu0 %v3939_v16 }
 0x160   : > { %3595 = vmatpush3.bf16.msra.mxu1 %v4135_v3  ;;  %3596 = vmatprep.mubr.msk.bf16.mxu1 %vm3940_vm1, %v3939_v16  ;;  %v3538_v3 = vpop.f32.mrf.mxu1 }
 0x161   : > { %3606 = vmatprep.subr.bf16.mxu1 %v3939_v16 }
 0x162   : > { %3590 = vmatpush3.xpose.msk.msra.mxu0 %vm1007_vm0, %v673_v61 }
 0x163   : > { %3600 = vmatprep.subr.bf16.mxu0 %v3939_v16 }
 0x165   : > { %3592 = vmatmul.mubr.msk.f32.vlgmr.msra.gmra.mxu0 %vm1007_vm0, %v4175_v24 }
 0x166   : > { %3601 = vmatpush3.bf16.msra.mxu0 %v4142_v7  ;;  %3602 = vmatprep.mubr.msk.bf16.mxu0 %vm3940_vm1, %v3939_v16 }
 0x167   : > { %3612 = vmatprep.subr.bf16.mxu0 %v3939_v16 }
 0x205   : > { %v1048_v5 = vpop.f32.mrf.mxu0 }
 0x207   : > { %v3543_v6 = vpop.f32.mrf.mxu0  ;;  %v1099_v7 = vpop.f32.mrf.mxu1 }
 0x208   : > { %v1419_v27 = vrot.slane %v1099_v7, 7 }
 0x209   : > { %v1051_v8 = vpop.f32.mrf.mxu0  ;;  %v3549_v9 = vpop.f32.mrf.mxu1 }
 0x20a   : > { %v1421_v34 = vsel %vm1420_vm2, %v1419_v27, %v1048_v5  ;;  %v4288_v5 = vmul.f32 1e+30, %v3332_v55  ;;  %v4342_v55 = vld [vmem:[%s4078_s13 + $0x40] sm:$0xff]  }
 0x20b   : > { %v3544_v10 = vpop.f32.mrf.mxu0  ;;  %v1102_v12 = vpop.f32.mrf.mxu1 }
 0x20d   : > { %v3550_v13 = vpop.f32.mrf.mxu1  ;;  %v1150_v15 = vpop.f32.mrf.mxu0 }
 0x20e   : > { %v1422_v31 = vrot.slane %v1150_v15, 6 }
 0x20f   : > { %v3555_v17 = vpop.f32.mrf.mxu0  ;;  %v1201_v18 = vpop.f32.mrf.mxu1 }
 0x210   : > { %v1425_v35 = vrot.slane %v1201_v18, 5  ;;  %v1424_v39 = vsel %vm1423_vm3, %v1422_v31, %v1421_v34 }
 0x211   : > { %v1153_v20 = vpop.f32.mrf.mxu0  ;;  %v3561_v23 = vpop.f32.mrf.mxu1 }
 0x212   : > { %v1427_v44 = vsel %vm1426_vm4, %v1425_v35, %v1424_v39 }
 0x213   : > { %v3556_v24 = vpop.f32.mrf.mxu0  ;;  %v1204_v25 = vpop.f32.mrf.mxu1 }
 0x215   : > { %v3562_v28 = vpop.f32.mrf.mxu1  ;;  %v1252_v30 = vpop.f32.mrf.mxu0 }
 0x216   : > { %v1428_v41 = vrot.slane %v1252_v30, 4 }
 0x217   : > { %v3567_v32 = vpop.f32.mrf.mxu0  ;;  %v1303_v33 = vpop.f32.mrf.mxu1 }
 0x218   : > { %v1431_v45 = vrot.slane %v1303_v33, 3  ;;  %v1430_v51 = vsel %vm1429_vm5, %v1428_v41, %v1427_v44 }
 0x219   : > { %v1255_v36 = vpop.f32.mrf.mxu0  ;;  %v3573_v38 = vpop.f32.mrf.mxu1 }
 0x21a   : > { %v1433_v56 = vsel %vm1432_vm6, %v1431_v45, %v1430_v51  ;;  %v767_v45 = vsub.s32 1, %v4157_v11 }
 0x21b   : > { %v3568_v42 = vpop.f32.mrf.mxu0  ;;  %v1306_v43 = vpop.f32.mrf.mxu1 }
 0x21d   : > { %v3574_v46 = vpop.f32.mrf.mxu1  ;;  %v1354_v48 = vpop.f32.mrf.mxu0 }
 0x21e   : > { %v1434_v52 = vrot.slane %v1354_v48, 2  ;;  %v768_v48 = vrot.slane %v4167_v19, %v767_v45 }
 0x21f   : > { %v3579_v53 = vpop.f32.mrf.mxu0  ;;  %v1405_v54 = vpop.f32.mrf.mxu1 }
 0x220   : > { %v1437_v57 = vrot.slane %v1405_v54, 1  ;;  %v1436_v60 = vsel %vm1435_vm7, %v1434_v52, %v1433_v56  ;;  %v4336_v53 = vadd.f32 %v4272_v4, %v768_v48 }
 0x221   : > { %v1357_v58 = vpop.f32.mrf.mxu0  ;;  %v3585_v59 = vpop.f32.mrf.mxu1 }
 0x222   : > { %v1439_v7 = vsel %vm1438_vm8, %v1437_v57, %v1436_v60  ;;  %v2073_v56 = vrot.slane %v4336_v53, %v4173_v22  ;;  %v2140_v58 = vsel %vm1007_vm0, %v4342_v55, 0  ;;  %v4356_v60 = vld [vmem:[%s4078_s13 + $0x48] sm:$0xff]  }
 0x223   : > { %v3580_v61 = vpop.f32.mrf.mxu0  ;;  %v1408_v3 = vpop.f32.mrf.mxu1 }
 0x224   : > { %v2089_v61 = vrot.slane %v2073_v56, %v4173_v22  ;;  %v2191_v3 = vsel %vm1007_vm0, %v4356_v60, 0 }
 0x225   : > { %v3586_v6 = vpop.f32.mrf.mxu1  ;;  %v1515_v8 = vpop.f32.mrf.mxu0 }
 0x226   : > { %v1516_v9 = vadd.f32 %v1515_v8, %v1439_v7  ;;  %v2123_v6 = vpack.c.bf16 %v2089_v61, %v2089_v61 }
 0x227   : > { %v3593_v10 = vpop.f32.mrf.mxu0 }
 0x228   : > { %v1519_v12 = vadd.f32 %v1516_v9, %v4288_v5  ;;  %v4379_v9 = vld [vmem:[%s4078_s13 + $0x58] sm:$0xff]   ;;  %v2066_v10 = vcombine.high %v4336_v53, %v4336_v53 }
 0x22a   : > { %v1521_v13 = vsel %vm1520_vm9, %v1519_v12, -inf }
 0x22b   : > { %1522 = vmax.xlane.f32.xlu0 %v1521_v13  ;;  %v4387_v13 = vld [vmem:[%s4078_s13 + $0x60] sm:$0xff]  }
 0x2b4   : > { %v1523_v15 = vpop.xlane.xlu0 %1522 }
 0x2b5   : > { %v1524_v17 = vsub.f32 %v1519_v12, %v1523_v15  ;;  %v2111_v12 = vcombine.high %v2089_v61, %v2089_v61 }
 0x2b7   : > { %v1525_v18 = vmul.f32 1.442695, %v1524_v17  ;;  %v2293_v17 = vsel %vm1007_vm0, %v4379_v9, 0 }
 0x2b9   : > { %3831 = vpow2.f32 %v1525_v18  ;;  %v2080_v18 = vrot.slane %v2066_v10, %v4173_v22 }
 0x2c6   : > { %v3832_v20 = vpop.eup %3831 }
 0x2c7   : > { %v1527_v23 = vmul.f32 %v3832_v20, %v4282_v50  ;;  %v2125_v20 = vpack.c.bf16 %v2111_v12, %v2111_v12 }
 0x2c9   : > { %v1528_v24 = vsel %vm1520_vm9, %v1527_v23, 0.0 }
 0x2ca   : > { %1529 = vadd.xlane.f32.xlu0 %v1528_v24 }
 0x353   : > { %v1530_v25 = vpop.xlane.xlu0 %1529 }
 0x354   : > { %3833 = vrcp.f32 %v1530_v25  ;;  %vm1531_vm10 = vcmp.gt.f32.partialorder %v1530_v25, 0.0  ;;  %v4400_v25 = vld [vmem:[%s4078_s13 + $0x68] sm:$0xff]  }
 0x361   : > { %v3834_v27 = vpop.eup %3833 }
 0x362   : > { %v1533_v28 = vsel %vm1531_vm10, %v3834_v27, 0.0  ;;  %v2096_v27 = vrot.slane %v2080_v18, %v4173_v22 }
 0x363   : > { %v4295_v30 = vmul.f32 %v1533_v28, %v1527_v23  ;;  %v2344_v23 = vsel %vm1007_vm0, %v4387_v13, 0  ;;  %v4407_v28 = vld [vmem:[%s4078_s13 + $0x70] sm:$0xff]  }
 0x365   : > { %v1543_v31 = vrot.slane %v4295_v30, %v4173_v22  ;;  %v1536_v36 = vcombine.high %v4295_v30, %v4295_v30 }
 0x367   : > { %v1551_v32 = vcombine.high %v1543_v31, %v1543_v31  ;;  %v1559_v33 = vrot.slane %v1543_v31, %v4173_v22  ;;  %v1550_v41 = vrot.slane %v1536_v36, %v4173_v22 }
 0x369   : > { %v1573_v34 = vrot.slane %v1551_v32, %v4173_v22  ;;  %v1593_v35 = vpack.c.bf16 %v1559_v33, %v1559_v33  ;;  %v1581_v39 = vcombine.high %v1559_v33, %v1559_v33  ;;  %v2395_v32 = vsel %vm1007_vm0, %v4400_v25, 0 }
 0x36a   : > { %v2127_v33 = vpack.c.bf16 %v2096_v27, %v2096_v27 }
 0x36b   : > { %v1594_v38 = vpack.c.bf16 %v1573_v34, %v1573_v34  ;;  %3597 = vmatmul.mubr.msk.bf16.vlgmr.msra.gmra.mxu1 %vm1520_vm9, %v1593_v35  ;;  %v1583_v42 = vcombine.high %v1573_v34, %v1573_v34  ;;  %v1595_v43 = vpack.c.bf16 %v1581_v39, %v1581_v39  ;;  %v2446_v34 = vsel %vm1007_vm0, %v4407_v28, 0 }
 0x36c   : > { %3607 = vmatpush3.bf16.msra.mxu1 %v4180_v26  ;;  %3608 = vmatprep.mubr.msk.bf16.mxu1 %vm3940_vm1, %v3939_v16  ;;  %v1552_v26 = vcombine.high %v1550_v41, %v1550_v41  ;;  %v592_v35 = vsub.s32 3, %v4157_v11  ;;  %v2112_v39 = vcombine.high %v2096_v27, %v2096_v27 }
 0x36d   : > { %3603 = vmatmul.mubr.msk.bf16.vlgmr.msra.gmra.mxu0 %vm1520_vm9, %v1594_v38  ;;  %3618 = vmatprep.subr.bf16.mxu1 %v3939_v16  ;;  %v1596_v44 = vpack.c.bf16 %v1583_v42, %v1583_v42  ;;  %v4421_v38 = vld [vmem:[%s4078_s13 + $0x78] sm:$0xff]  }
 0x36e   : > { %3613 = vmatpush3.bf16.msra.mxu0 %v4184_v29  ;;  %3614 = vmatprep.mubr.msk.bf16.mxu0 %vm3940_vm1, %v3939_v16  ;;  %v1566_v29 = vrot.slane %v1550_v41, %v4173_v22  ;;  %v1580_v46 = vrot.slane %v1552_v26, %v4173_v22  ;;  %v593_v41 = vrot.slane %v4167_v19, %v592_v35 }
 0x36f   : > { %3624 = vmatprep.subr.bf16.mxu0 %v3939_v16  ;;  %v2129_v26 = vpack.c.bf16 %v2112_v39, %v2112_v39 }
 0x370   : > { %v1598_v51 = vpack.c.bf16 %v1580_v46, %v1580_v46  ;;  %v1582_v52 = vcombine.high %v1566_v29, %v1566_v29  ;;  %v1584_v54 = vcombine.high %v1580_v46, %v1580_v46  ;;  %v675_v45 = vadd.f32 %v4159_v14, %v593_v41 }
 0x372   : > { %v1600_v57 = vpack.c.bf16 %v1584_v54, %v1584_v54 }
 0x373   : > { %3609 = vmatmul.mubr.msk.bf16.vlgmr.msra.gmra.mxu1 %vm1520_vm9, %v1595_v43  ;;  %v2497_v43 = vsel %vm1007_vm0, %v4421_v38, 0 }
 0x374   : > { %3619 = vmatpush3.bf16.msra.mxu1 %v4196_v37  ;;  %3620 = vmatprep.mubr.msk.bf16.mxu1 %vm3940_vm1, %v3939_v16  ;;  %v1597_v37 = vpack.c.bf16 %v1566_v29, %v1566_v29 }
 0x375   : > { %3615 = vmatmul.mubr.msk.bf16.vlgmr.msra.gmra.mxu0 %vm1520_vm9, %v1596_v44  ;;  %3630 = vmatprep.subr.bf16.mxu1 %v3939_v16  ;;  %v681_v44 = vadd.f32 %v4170_v21, %v593_v41 }
 0x376   : > { %3625 = vmatpush3.bf16.msra.mxu0 %v4205_v40  ;;  %3626 = vmatprep.mubr.msk.bf16.mxu0 %vm3940_vm1, %v3939_v16  ;;  %v596_v40 = vsub.s32 4, %v4157_v11 }
 0x377   : > { %3636 = vmatprep.subr.bf16.mxu0 %v3939_v16 }
 0x37b   : > { %3621 = vmatmul.mubr.msk.bf16.vlgmr.msra.gmra.mxu1 %vm1520_vm9, %v1597_v37 }
 0x37c   : > { %3631 = vmatpush3.bf16.msra.mxu1 %v4219_v47  ;;  %3632 = vmatprep.mubr.msk.bf16.mxu1 %vm3940_vm1, %v3939_v16  ;;  %v597_v47 = vrot.slane %v4167_v19, %v596_v40 }
 0x37d   : > { %3627 = vmatmul.mubr.msk.bf16.vlgmr.msra.gmra.mxu0 %vm1520_vm9, %v1598_v51  ;;  %3642 = vmatprep.subr.mxu1 %v3939_v16 }
 0x37e   : > { %3637 = vmatpush3.bf16.msra.mxu0 %v4226_v49  ;;  %3638 = vmatprep.mubr.msk.bf16.mxu0 %vm3940_vm1, %v3939_v16  ;;  %v1599_v49 = vpack.c.bf16 %v1582_v52, %v1582_v52  ;;  %v756_v4 = vadd.f32 %v4266_v0, %v597_v47  ;;  %v750_v59 = vadd.f32 %v4262_v62, %v597_v47  ;;  %v4362_v0 = vld [vmem:[%s4078_s13 + $0x50] sm:$0xff]   ;;  %s3942_s13 = smov 8  }
 0x37f   : > { %3649 = vmatprep.subr.bf16.mxu0 %v3939_v16  ;;  %v2081_v62 = vcombine.high %v2073_v56, %v2073_v56  ;;  %v2242_v7 = vsel %vm1007_vm0, %v4362_v0, 0 }
 0x381   : > { %v2103_v8 = vrot.slane %v2081_v62, %v4173_v22 }
 0x383   : > { %3633 = vmatmul.mubr.msk.bf16.vlgmr.msra.gmra.mxu1 %vm1520_vm9, %v1599_v49  ;;  %v2124_v15 = vpack.c.bf16 %v2103_v8, %v2103_v8  ;;  %v2113_v24 = vcombine.high %v2103_v8, %v2103_v8 }
 0x384   : > { %3643 = vmatpush3.msra.mxu1 %v756_v4  ;;  %3646 = vmatprep.mubr.msk.f32.mxu1 %vm3940_vm1, %v3939_v16 }
 0x385   : > { %3639 = vmatmul.mubr.msk.bf16.vlgmr.msra.gmra.mxu0 %vm1520_vm9, %v1600_v57  ;;  %3644 = vmatprep.subr.mxu1 %v3939_v16  ;;  %v2126_v31 = vpack.c.bf16 %v2113_v24, %v2113_v24 }
 0x386   : > { %3650 = vmatpush3.bf16.xpose.msra.mxu0 %v2140_v58  ;;  %3645 = vmatpush3.msra.mxu1 %v750_v59 }
 0x387   : > { %3655 = vmatprep.subr.bf16.mxu1 %v3939_v16  ;;  %3651 = vmatprep.mubr.msk.bf16.mxu0 %vm3940_vm1, %v3939_v16 }
 0x388   : > { %3661 = vmatprep.subr.bf16.mxu0 %v3939_v16 }
 0x38b   : > { %3647 = vmatmul.mubr.msk.f32.vlgmr.msra.gmra.mxu1 %vm1520_vm9, %v4295_v30  ;;  %v2082_v30 = vcombine.high %v2080_v18, %v2080_v18 }
 0x38c   : > { %3656 = vmatpush3.bf16.xpose.msra.mxu1 %v2191_v3  ;;  %3657 = vmatprep.mubr.msk.bf16.mxu1 %vm3940_vm1, %v3939_v16 }
 0x38d   : > { %3652 = vmatmul.mubr.msk.bf16.vlgmr.msra.gmra.mxu0 %vm1007_vm0, %v2123_v6  ;;  %3667 = vmatprep.subr.bf16.mxu1 %v3939_v16  ;;  %v2110_v36 = vrot.slane %v2082_v30, %v4173_v22 }
 0x38e   : > { %3662 = vmatpush3.bf16.xpose.msra.mxu0 %v2242_v7  ;;  %3663 = vmatprep.mubr.msk.bf16.mxu0 %vm3940_vm1, %v3939_v16 }
 0x38f   : > { %3673 = vmatprep.subr.bf16.mxu0 %v3939_v16  ;;  %v2128_v42 = vpack.c.bf16 %v2110_v36, %v2110_v36  ;;  %v2114_v29 = vcombine.high %v2110_v36, %v2110_v36 }
 0x391   : > { %v2130_v21 = vpack.c.bf16 %v2114_v29, %v2114_v29 }
 0x393   : > { %3658 = vmatmul.mubr.msk.bf16.vlgmr.msra.gmra.mxu1 %vm1007_vm0, %v2124_v15 }
 0x394   : > { %3668 = vmatpush3.bf16.xpose.msra.mxu1 %v2293_v17  ;;  %3669 = vmatprep.mubr.msk.bf16.mxu1 %vm3940_vm1, %v3939_v16 }
 0x395   : > { %3664 = vmatmul.mubr.msk.bf16.vlgmr.msra.gmra.mxu0 %vm1007_vm0, %v2125_v20  ;;  %3679 = vmatprep.subr.bf16.mxu1 %v3939_v16 }
 0x396   : > { %3674 = vmatpush3.bf16.xpose.msra.mxu0 %v2344_v23  ;;  %3675 = vmatprep.mubr.msk.bf16.mxu0 %vm3940_vm1, %v3939_v16 }
 0x397   : > { %3685 = vmatprep.subr.bf16.mxu0 %v3939_v16 }
 0x39b   : > { %3670 = vmatmul.mubr.msk.bf16.vlgmr.msra.gmra.mxu1 %vm1007_vm0, %v2126_v31 }
 0x39c   : > { %3680 = vmatpush3.bf16.xpose.msra.mxu1 %v2395_v32  ;;  %3681 = vmatprep.mubr.msk.bf16.mxu1 %vm3940_vm1, %v3939_v16 }
 0x39d   : > { %3676 = vmatmul.mubr.msk.bf16.vlgmr.msra.gmra.mxu0 %vm1007_vm0, %v2127_v33  ;;  %3691 = vmatprep.subr.bf16.mxu1 %v3939_v16 }
 0x39e   : > { %3686 = vmatpush3.bf16.xpose.msra.mxu0 %v2446_v34  ;;  %3687 = vmatprep.mubr.msk.bf16.mxu0 %vm3940_vm1, %v3939_v16 }
 0x39f   : > { %3697 = vmatprep.subr.mxu0 %v3939_v16 }
 0x3a3   : > { %3682 = vmatmul.mubr.msk.bf16.vlgmr.msra.gmra.mxu1 %vm1007_vm0, %v2128_v42 }
 0x3a4   : > { %3692 = vmatpush3.bf16.xpose.msra.mxu1 %v2497_v43  ;;  %3693 = vmatprep.mubr.msk.bf16.mxu1 %vm3940_vm1, %v3939_v16 }
 0x3a5   : > { %3688 = vmatmul.mubr.msk.bf16.vlgmr.msra.gmra.mxu0 %vm1007_vm0, %v2129_v26  ;;  %3710 = vmatprep.subr.bf16.mxu1 %v3939_v16 }
 0x3a6   : > { %3698 = vmatpush3.xpose.msk.msra.mxu0 %vm1007_vm0, %v681_v44  ;;  %3701 = vmatprep.mubr.msk.f32.mxu0 %vm3940_vm1, %v3939_v16 }
 0x3a7   : > { %3699 = vmatprep.subr.mxu0 %v3939_v16 }
 0x3aa   : > { %3700 = vmatpush3.xpose.msk.msra.mxu0 %vm1007_vm0, %v675_v45 }
 0x3ab   : > { %3704 = vmatprep.subr.bf16.mxu0 %v3939_v16  ;;  %3694 = vmatmul.mubr.msk.bf16.vlgmr.msra.gmra.mxu1 %vm1007_vm0, %v2130_v21 }
 0x3ac   : > { %3711 = vmatpush3.bf16.msra.mxu1 %v4356_v60  ;;  %3712 = vmatprep.mubr.msk.bf16.mxu1 %vm3940_vm1, %v3939_v16 }
 0x3ad   : > { %3702 = vmatmul.mubr.msk.f32.vlgmr.msra.gmra.mxu0 %vm1007_vm0, %v4336_v53  ;;  %3722 = vmatprep.subr.bf16.mxu1 %v3939_v16 }
 0x3ae   : > { %3705 = vmatpush3.bf16.msra.mxu0 %v4342_v55  ;;  %3706 = vmatprep.mubr.msk.bf16.mxu0 %vm3940_vm1, %v3939_v16 }
 0x3af   : > { %3716 = vmatprep.subr.bf16.mxu0 %v3939_v16 }
 0x42b   : > { %v1639_v14 = vpop.f32.mrf.mxu1 }
 0x42d   : > { %v1683_v46 = vpop.f32.mrf.mxu0  ;;  %v3598_v37 = vpop.f32.mrf.mxu1 }
 0x42e   : > { %v1961_v48 = vrot.slane %v1683_v46, 7 }
 0x42f   : > { %v3604_v51 = vpop.f32.mrf.mxu0  ;;  %v1642_v52 = vpop.f32.mrf.mxu1 }
 0x430   : > { %v1962_v40 = vsel %vm1420_vm2, %v1961_v48, %v1639_v14 }
 0x431   : > { %v1686_v53 = vpop.f32.mrf.mxu0  ;;  %v3599_v54 = vpop.f32.mrf.mxu1 }
 0x433   : > { %v3605_v55 = vpop.f32.mrf.mxu0  ;;  %v1727_v47 = vpop.f32.mrf.mxu1 }
 0x434   : > { %v1963_v49 = vrot.slane %v1727_v47, 6 }
 0x435   : > { %v1771_v56 = vpop.f32.mrf.mxu0  ;;  %v3610_v4 = vpop.f32.mrf.mxu1 }
 0x436   : > { %v1965_v57 = vrot.slane %v1771_v56, 5  ;;  %v1964_v58 = vsel %vm1423_vm3, %v1963_v49, %v1962_v40 }
 0x437   : > { %v3616_v59 = vpop.f32.mrf.mxu0  ;;  %v1730_v61 = vpop.f32.mrf.mxu1 }
 0x438   : > { %v1966_v60 = vsel %vm1426_vm4, %v1965_v57, %v1964_v58 }
 0x439   : > { %v1774_v62 = vpop.f32.mrf.mxu0  ;;  %v3611_v3 = vpop.f32.mrf.mxu1 }
 0x43b   : > { %v3617_v6 = vpop.f32.mrf.mxu0  ;;  %v1815_v7 = vpop.f32.mrf.mxu1 }
 0x43c   : > { %v1967_v8 = vrot.slane %v1815_v7, 4 }
 0x43d   : > { %v1859_v10 = vpop.f32.mrf.mxu0  ;;  %v3622_v12 = vpop.f32.mrf.mxu1 }
 0x43e   : > { %v1969_v15 = vrot.slane %v1859_v10, 3  ;;  %v1968_v17 = vsel %vm1429_vm5, %v1967_v8, %v1966_v60 }
 0x43f   : > { %v3628_v18 = vpop.f32.mrf.mxu0  ;;  %v1818_v23 = vpop.f32.mrf.mxu1 }
 0x440   : > { %v1970_v20 = vsel %vm1432_vm6, %v1969_v15, %v1968_v17 }
 0x441   : > { %v1862_v24 = vpop.f32.mrf.mxu0  ;;  %v3623_v27 = vpop.f32.mrf.mxu1 }
 0x443   : > { %v3629_v30 = vpop.f32.mrf.mxu0  ;;  %v1903_v31 = vpop.f32.mrf.mxu1 }
 0x444   : > { %v1971_v32 = vrot.slane %v1903_v31, 2 }
 0x445   : > { %v1947_v33 = vpop.f32.mrf.mxu0  ;;  %v3634_v34 = vpop.f32.mrf.mxu1 }
 0x446   : > { %v1973_v35 = vrot.slane %v1947_v33, 1  ;;  %v1972_v39 = vsel %vm1435_vm7, %v1971_v32, %v1970_v20 }
 0x447   : > { %v3640_v36 = vpop.f32.mrf.mxu0  ;;  %v1906_v41 = vpop.f32.mrf.mxu1 }
 0x448   : > { %v1974_v42 = vsel %vm1438_vm8, %v1973_v35, %v1972_v39 }
 0x449   : > { %v1950_v43 = vpop.f32.mrf.mxu0  ;;  %v3635_v26 = vpop.f32.mrf.mxu1 }
 0x44b   : > { %v3641_v44 = vpop.f32.mrf.mxu0  ;;  %v2044_v29 = vpop.f32.mrf.mxu1 }
 0x44c   : > { %v4461_v45 = vadd.f32 %v2044_v29, %v1974_v42 }
 0x44d   : > { %v2176_v21 = vpop.f32.mrf.mxu0  ;;  %v3648_v14 = vpop.f32.mrf.mxu1 }
 0x44f   : > { %v3653_v46 = vpop.f32.mrf.mxu0 }
 0x451   : > { %v2179_v37 = vpop.f32.mrf.mxu0 }
 0x453   : > { %v3654_v48 = vpop.f32.mrf.mxu0  ;;  %v2227_v51 = vpop.f32.mrf.mxu1 }
 0x454   : > { %v2547_v6 = vrot.slane %v2227_v51, 7 }
 0x455   : > { %v2278_v40 = vpop.f32.mrf.mxu0  ;;  %v3659_v52 = vpop.f32.mrf.mxu1 }
 0x456   : > { %v2549_v8 = vrot.slane %v2278_v40, 6  ;;  %v2548_v20 = vsel %vm1420_vm2, %v2547_v6, %v2176_v21 }
 0x457   : > { %v3665_v53 = vpop.f32.mrf.mxu0  ;;  %v2230_v54 = vpop.f32.mrf.mxu1 }
 0x458   : > { %v2550_v27 = vsel %vm1423_vm3, %v2549_v8, %v2548_v20 }
 0x459   : > { %v2281_v55 = vpop.f32.mrf.mxu0  ;;  %v3660_v47 = vpop.f32.mrf.mxu1 }
 0x45b   : > { %v3666_v49 = vpop.f32.mrf.mxu0  ;;  %v2329_v56 = vpop.f32.mrf.mxu1 }
 0x45c   : > { %v2551_v12 = vrot.slane %v2329_v56, 5 }
 0x45d   : > { %v2380_v4 = vpop.f32.mrf.mxu0  ;;  %v3671_v57 = vpop.f32.mrf.mxu1 }
 0x45e   : > { %v2553_v17 = vrot.slane %v2380_v4, 4  ;;  %v2552_v32 = vsel %vm1426_vm4, %v2551_v12, %v2550_v27  ;;  %v600_v12 = vsub.s32 5, %v4157_v11 }
 0x45f   : > { %v3677_v58 = vpop.f32.mrf.mxu0  ;;  %v2332_v59 = vpop.f32.mrf.mxu1 }
 0x460   : > { %v2554_v34 = vsel %vm1429_vm5, %v2553_v17, %v2552_v32 }
 0x461   : > { %v2383_v60 = vpop.f32.mrf.mxu0  ;;  %v3672_v61 = vpop.f32.mrf.mxu1 }
 0x463   : > { %v3678_v62 = vpop.f32.mrf.mxu0  ;;  %v2431_v3 = vpop.f32.mrf.mxu1 }
 0x464   : > { %v2555_v23 = vrot.slane %v2431_v3, 3 }
 0x465   : > { %v2482_v7 = vpop.f32.mrf.mxu0  ;;  %v3683_v10 = vpop.f32.mrf.mxu1 }
 0x466   : > { %v2557_v30 = vrot.slane %v2482_v7, 2  ;;  %v2556_v36 = vsel %vm1432_vm6, %v2555_v23, %v2554_v34 }
 0x467   : > { %v3689_v15 = vpop.f32.mrf.mxu0  ;;  %v2434_v18 = vpop.f32.mrf.mxu1 }
 0x468   : > { %v2558_v43 = vsel %vm1435_vm7, %v2557_v30, %v2556_v36  ;;  %v601_v15 = vrot.slane %v4167_v19, %v600_v12 }
 0x469   : > { %v2485_v24 = vpop.f32.mrf.mxu0  ;;  %v3684_v31 = vpop.f32.mrf.mxu1 }
 0x46a   : > { %v758_v18 = vadd.f32 %v4268_v1, %v601_v15 }
 0x46b   : > { %v3690_v33 = vpop.f32.mrf.mxu0  ;;  %v2533_v35 = vpop.f32.mrf.mxu1 }
 0x46c   : > { %v2559_v39 = vrot.slane %v2533_v35, 1 }
 0x46d   : > { %v2636_v41 = vpop.f32.mrf.mxu0  ;;  %v3695_v42 = vpop.f32.mrf.mxu1 }
 0x46e   : > { %v2560_v26 = vsel %vm1438_vm8, %v2559_v39, %v2558_v43 }
 0x46f   : > { %v3703_v44 = vpop.f32.mrf.mxu0  ;;  %v2637_v29 = vadd.f32 %v2636_v41, %v2560_v26  ;;  %v2536_v21 = vpop.f32.mrf.mxu1 }
 0x471   : > { %v3696_v14 = vpop.f32.mrf.mxu1  ;;  %v2640_v46 = vadd.f32 %v2637_v29, %v4288_v5 }
 0x473   : > { %v2641_v37 = vsel %vm1520_vm9, %v2640_v46, -inf }
 0x474   : > { %2642 = vmax.xlane.f32.xlu1 %v2641_v37 }
 0x4fd   : > { %v2643_v48 = vpop.xlane.xlu1 %2642 }
 0x4fe   : > { %v2644_v51 = vsub.f32 %v2640_v46, %v2643_v48 }
 0x500   : > { %v2645_v40 = vmul.f32 1.442695, %v2644_v51 }
 0x502   : > { %3835 = vpow2.f32 %v2645_v40 }
 0x50f   : > { %v3836_v52 = vpop.eup %3835 }
 0x510   : > { %v2647_v53 = vmul.f32 %v3836_v52, %v4282_v50 }
 0x512   : > { %v2648_v54 = vsel %vm1520_vm9, %v2647_v53, 0.0 }
 0x513   : > { %2649 = vadd.xlane.f32.xlu1 %v2648_v54 }
 0x59c   : > { %v2650_v55 = vpop.xlane.xlu1 %2649 }
 0x59d   : > { %3837 = vrcp.f32 %v2650_v55  ;;  %vm2651_vm11 = vcmp.gt.f32.partialorder %v2650_v55, 0.0 }
 0x5aa   : > { %v3838_v47 = vpop.eup %3837 }
 0x5ab   : > { %v2653_v49 = vsel %vm2651_vm11, %v3838_v47, 0.0 }
 0x5ac   : > { %v2654_v56 = vmul.f32 %v2653_v49, %v2647_v53 }
 0x5ae   : > { %v2663_v5 = vrot.slane %v2654_v56, %v4173_v22  ;;  %v2656_v60 = vcombine.high %v2654_v56, %v2654_v56 }
 0x5b0   : > { %v2671_v4 = vcombine.high %v2663_v5, %v2663_v5  ;;  %v2679_v57 = vrot.slane %v2663_v5, %v4173_v22  ;;  %v2670_v62 = vrot.slane %v2656_v60, %v4173_v22 }
 0x5b2   : > { %v2693_v58 = vrot.slane %v2671_v4, %v4173_v22  ;;  %v2713_v59 = vpack.c.bf16 %v2679_v57, %v2679_v57  ;;  %v2701_v50 = vcombine.high %v2679_v57, %v2679_v57 }
 0x5b4   : > { %v2714_v61 = vpack.c.bf16 %v2693_v58, %v2693_v58  ;;  %3707 = vmatmul.mubr.msk.bf16.vlgmr.msra.gmra.mxu0 %vm1520_vm9, %v2713_v59  ;;  %v2703_v3 = vcombine.high %v2693_v58, %v2693_v58  ;;  %v2715_v6 = vpack.c.bf16 %v2701_v50, %v2701_v50 }
 0x5b5   : > { %3717 = vmatpush3.bf16.msra.mxu0 %v4362_v0  ;;  %3718 = vmatprep.mubr.msk.bf16.mxu0 %vm3940_vm1, %v3939_v16  ;;  %v2672_v0 = vcombine.high %v2670_v62, %v2670_v62 }
 0x5b6   : > { %3713 = vmatmul.mubr.msk.bf16.vlgmr.msra.gmra.mxu1 %vm1520_vm9, %v2714_v61  ;;  %3728 = vmatprep.subr.bf16.mxu0 %v3939_v16  ;;  %v2716_v7 = vpack.c.bf16 %v2703_v3, %v2703_v3 }
 0x5b7   : > { %3723 = vmatpush3.bf16.msra.mxu1 %v4379_v9  ;;  %3724 = vmatprep.mubr.msk.bf16.mxu1 %vm3940_vm1, %v3939_v16  ;;  %v2686_v9 = vrot.slane %v2670_v62, %v4173_v22  ;;  %v2700_v8 = vrot.slane %v2672_v0, %v4173_v22 }
 0x5b8   : > { %3734 = vmatprep.subr.bf16.mxu1 %v3939_v16 }
 0x5b9   : > { %v2717_v10 = vpack.c.bf16 %v2686_v9, %v2686_v9  ;;  %v2702_v22 = vcombine.high %v2686_v9, %v2686_v9  ;;  %v771_v9 = vsub.s32 6, %v4157_v11 }
 0x5bb   : > { %v2719_v17 = vpack.c.bf16 %v2702_v22, %v2702_v22 }
 0x5bc   : > { %3719 = vmatmul.mubr.msk.bf16.vlgmr.msra.gmra.mxu0 %vm1520_vm9, %v2715_v6 }
 0x5bd   : > { %3729 = vmatpush3.bf16.msra.mxu0 %v4387_v13  ;;  %3730 = vmatprep.mubr.msk.bf16.mxu0 %vm3940_vm1, %v3939_v16  ;;  %v2718_v13 = vpack.c.bf16 %v2700_v8, %v2700_v8 }
 0x5be   : > { %3725 = vmatmul.mubr.msk.bf16.vlgmr.msra.gmra.mxu1 %vm1520_vm9, %v2716_v7  ;;  %3740 = vmatprep.subr.bf16.mxu0 %v3939_v16 }
 0x5bf   : > { %3735 = vmatpush3.bf16.msra.mxu1 %v4400_v25  ;;  %3736 = vmatprep.mubr.msk.bf16.mxu1 %vm3940_vm1, %v3939_v16  ;;  %v2704_v25 = vcombine.high %v2700_v8, %v2700_v8  ;;  %v3843_v8 = vld [vmem:[%s4581_s5] sm:$0xff] }
 0x5c0   : > { %3746 = vmatprep.subr.bf16.mxu1 %v3939_v16 }
 0x5c4   : > { %3731 = vmatmul.mubr.msk.bf16.vlgmr.msra.gmra.mxu0 %vm1520_vm9, %v2717_v10  ;;  %v772_v10 = vrot.slane %v3843_v8, %v771_v9 }
 0x5c5   : > { %3741 = vmatpush3.bf16.msra.mxu0 %v4407_v28  ;;  %3742 = vmatprep.mubr.msk.bf16.mxu0 %vm3940_vm1, %v3939_v16  ;;  %v2720_v28 = vpack.c.bf16 %v2704_v25, %v2704_v25 }
 0x5c6   : > { %3737 = vmatmul.mubr.msk.bf16.vlgmr.msra.gmra.mxu1 %vm1520_vm9, %v2718_v13  ;;  %3752 = vmatprep.subr.mxu0 %v3939_v16  ;;  %v914_v13 = vadd.f32 %v4270_v2, %v772_v10 }
 0x5c7   : > { %3747 = vmatpush3.bf16.msra.mxu1 %v4421_v38  ;;  %3748 = vmatprep.mubr.msk.bf16.mxu1 %vm3940_vm1, %v3939_v16  ;;  %v752_v38 = vadd.f32 %v4264_v63, %v601_v15 }
 0x5cc   : > { %3743 = vmatmul.mubr.msk.bf16.vlgmr.msra.gmra.mxu0 %vm1520_vm9, %v2719_v17 }
 0x5cd   : > { %3753 = vmatpush3.msra.mxu0 %v758_v18  ;;  %3756 = vmatprep.mubr.msk.f32.mxu0 %vm3940_vm1, %v3939_v16 }
 0x5ce   : > { %3749 = vmatmul.mubr.msk.bf16.vlgmr.msra.gmra.mxu1 %vm1520_vm9, %v2720_v28  ;;  %3754 = vmatprep.subr.mxu0 %v3939_v16 }
 0x5cf   : > { %3755 = vmatpush3.msra.mxu0 %v752_v38 }
 0x5d4   : > { %3757 = vmatmul.mubr.msk.f32.vlgmr.msra.gmra.mxu0 %vm1520_vm9, %v2654_v56 }
 0x674   : > { %v2759_v19 = vpop.f32.mrf.mxu0 }
 0x676   : > { %v2803_v20 = vpop.f32.mrf.mxu1  ;;  %v3708_v23 = vpop.f32.mrf.mxu0 }
 0x677   : > { %v3081_v16 = vrot.slane %v2803_v20, 7 }
 0x678   : > { %v3714_v1 = vpop.f32.mrf.mxu1  ;;  %v2762_v24 = vpop.f32.mrf.mxu0 }
 0x679   : > { %v3082_v21 = vsel %vm1420_vm2, %v3081_v16, %v2759_v19 }
 0x67a   : > { %v2806_v27 = vpop.f32.mrf.mxu1  ;;  %v3709_v30 = vpop.f32.mrf.mxu0 }
 0x67c   : > { %v3715_v31 = vpop.f32.mrf.mxu1  ;;  %v2847_v63 = vpop.f32.mrf.mxu0 }
 0x67d   : > { %v3083_v43 = vrot.slane %v2847_v63, 6 }
 0x67e   : > { %v2891_v32 = vpop.f32.mrf.mxu1  ;;  %v3720_v33 = vpop.f32.mrf.mxu0 }
 0x67f   : > { %v3085_v14 = vrot.slane %v2891_v32, 5  ;;  %v3084_v37 = vsel %vm1423_vm3, %v3083_v43, %v3082_v21 }
 0x680   : > { %v3726_v34 = vpop.f32.mrf.mxu1  ;;  %v2850_v35 = vpop.f32.mrf.mxu0 }
 0x681   : > { %v3086_v53 = vsel %vm1426_vm4, %v3085_v14, %v3084_v37 }
 0x682   : > { %v2894_v36 = vpop.f32.mrf.mxu1  ;;  %v3721_v39 = vpop.f32.mrf.mxu0 }
 0x684   : > { %v3727_v41 = vpop.f32.mrf.mxu1  ;;  %v2935_v42 = vpop.f32.mrf.mxu0 }
 0x685   : > { %v3087_v48 = vrot.slane %v2935_v42, 4 }
 0x686   : > { %v2979_v26 = vpop.f32.mrf.mxu1  ;;  %v3732_v44 = vpop.f32.mrf.mxu0 }
 0x687   : > { %v3089_v54 = vrot.slane %v2979_v26, 3  ;;  %v3088_v47 = vsel %vm1429_vm5, %v3087_v48, %v3086_v53 }
 0x688   : > { %v3738_v29 = vpop.f32.mrf.mxu1  ;;  %v2938_v46 = vpop.f32.mrf.mxu0 }
 0x689   : > { %v3090_v57 = vsel %vm1432_vm6, %v3089_v54, %v3088_v47 }
 0x68a   : > { %v2982_v51 = vpop.f32.mrf.mxu1  ;;  %v3733_v40 = vpop.f32.mrf.mxu0 }
 0x68c   : > { %v3739_v52 = vpop.f32.mrf.mxu1  ;;  %v3023_v55 = vpop.f32.mrf.mxu0 }
 0x68d   : > { %v3091_v49 = vrot.slane %v3023_v55, 2 }
 0x68e   : > { %v3067_v56 = vpop.f32.mrf.mxu1  ;;  %v3744_v5 = vpop.f32.mrf.mxu0 }
 0x68f   : > { %v3093_v58 = vrot.slane %v3067_v56, 1  ;;  %v3092_v61 = vsel %vm1435_vm7, %v3091_v49, %v3090_v57 }
 0x690   : > { %v3750_v4 = vpop.f32.mrf.mxu1  ;;  %v3026_v59 = vpop.f32.mrf.mxu0 }
 0x691   : > { %v3094_v3 = vsel %vm1438_vm8, %v3093_v58, %v3092_v61 }
 0x692   : > { %v3070_v60 = vpop.f32.mrf.mxu1  ;;  %v3745_v50 = vpop.f32.mrf.mxu0 }
 0x694   : > { %v3751_v62 = vpop.f32.mrf.mxu1  ;;  %v3164_v6 = vpop.f32.mrf.mxu0 }
 0x695   : > { %v3165_v0 = vadd.f32 %v3164_v6, %v3094_v3 }
 0x696   : > { %v3758_v7 = vpop.f32.mrf.mxu0 }
 0x697   : > { %3169 = vrot.lane.b32.xlu0 %v3165_v0, %s3942_s13 }
 0x709   : > { %v3170_v12 = vpop.permute.xlu0 %3169 }
 0x70a   : > { %v3172_v22 = vsel %vm1007_vm0, %v4461_v45, %v3170_v12 }
 0x70b   : > { %v3173_v25 = vadd.f32 %v3172_v22, %v914_v13 }
 0x70d   : > { %v3174_v15 = vmul.f32 0.70710677, %v3173_v25  ;;  %v3198_v39 = vmul.f32 0.5, %v3173_v25 }
 0x70f   : > { %v3175_v17 = vand.u32 2147483647, %v3174_v15  ;;  %vm3195_vm12 = vcmp.ge.f32.partialorder %v3174_v15, 0.0 }
 0x711   : > { %v3176_v18 = vmul.f32 0.3275911, %v3175_v17  ;;  %v3189_v38 = vsub.f32 0.0, %v3175_v17 }
 0x713   : > { %v3177_v28 = vadd.f32 1.0, %v3176_v18  ;;  %v3190_v11 = vmul.f32 %v3189_v38, %v3175_v17 }
 0x715   : > { %3839 = vrcp.f32 %v3177_v28  ;;  %v3191_v23 = vmul.f32 1.442695, %v3190_v11 }
 0x717   : > { %3841 = vpow2.f32 %v3191_v23 }
 0x722   : > { %v3840_v19 = vpop.eup %3839 }
 0x723   : > { %v3180_v20 = vmul.f32 1.0614054, %v3840_v19 }
 0x724   : > { %v3842_v32 = vpop.eup %3841 }
 0x725   : > { %v3181_v1 = vadd.f32 -1.4531521, %v3180_v20 }
 0x727   : > { %v3182_v24 = vmul.f32 %v3840_v19, %v3181_v1 }
 0x729   : > { %v3183_v2 = vadd.f32 1.4214138, %v3182_v24 }
 0x72b   : > { %v3184_v27 = vmul.f32 %v3840_v19, %v3183_v2 }
 0x72d   : > { %v3185_v30 = vadd.f32 -0.28449672, %v3184_v27 }
 0x72f   : > { %v3186_v45 = vmul.f32 %v3840_v19, %v3185_v30 }
 0x731   : > { %v3187_v31 = vadd.f32 0.2548296, %v3186_v45 }
 0x733   : > { %v3188_v63 = vmul.f32 %v3840_v19, %v3187_v31 }
 0x735   : > { %v3193_v33 = vmul.f32 %v3842_v32, %v3188_v63 }
 0x737   : > { %v3194_v34 = vsub.f32 1.0, %v3193_v33 }
 0x739   : > { %v3196_v35 = vsub.f32 0.0, %v3194_v34 }
 0x73b   : > { %v3197_v36 = vsel %vm3195_vm12, %v3194_v34, %v3196_v35 }
 0x73c   : > { %v3199_v41 = vadd.f32 1.0, %v3197_v36 }
 0x73e   : > { %v3200_v16 = vmul.f32 %v3199_v41, %v3198_v39 }
 0x740   : > { %v3201_v42 = vsel %vm1520_vm9, %v3200_v16, 0.0 }
 0x741   : > { %3202 = vst [vmem:[%s459_s18] sm:$0xff] %v3201_v42 }
 0x742   : > { %3883 = shalt.err (!%p3880_p2)
}
 0x743   : > { %s3884_s13 = scalar_lea.hbm %s4538_s28, 128  ;;  %s3888_s15 = scalar_lea.hbm %s4582_s6, 256 }
 0x744   : > { %p3885_p3 = scmp.ne.s32.totalorder %s4538_s28, %s3884_s13  ;;  %p3889_p8 = scmp.lt.s32.totalorder %s4538_s28, %s4582_s6 }
 0x745   : > { %p3890_p5 = scmp.lt.s32.totalorder %s3888_s15, %s3884_s13 }
 0x746   : > { %p3886_p4 = pnand %p3885_p3, %p4588_p10 }
 0x747   : > { %p3891_p6 = por %p3890_p5, %p3889_p8 }
 0x748   : > { %p3887_p7 = pneg %p3886_p4 }
 0x74a   : > { %p3892_p11 = pnand %p3891_p6, %p3887_p7 }
 0x74c   : > { %3895 = shalt.err (!%p3892_p11)
}
 0x74d   : > { %3763 = dma.vmem_to_hbm [thread:$0]  (%p4588_p10), %s3218_s19, 128, %s4538_s28, %s3204_s29  }
 0x74e PF: > { %s3229_s18 = sand.u32 1, %s3922_s21   ;;  %p4589_p12 = scmp.ne.s32.totalorder %s4586_s9, 0 }
 0x74f   : > { %s3230_s20 = scalar_lea.sflag [#allocation5], %s3229_s18 }
 0x750   : > { %p3770_p13 = pnand %p3321_p9, %p4589_p12 }
 0x752   : > { %p3771_p0 = pneg %p3770_p13 }
 0x754   : > { %3917 = dma.done.wait (%p3771_p0), %s3230_s20, 128  }
 0x755   : > { %3919 = vsyncadd (%p3771_p0), %s3230_s20, 4294967168  ;;  %p17_p1 = scmp.ge.s32.totalorder %s4004_s27, 4   ;;  %s4590_s21 = smov %s3926_s22 }
 0x756   : > { %s4591_s22 = smov %s3930_s23  ;;  %s4592_s23 = smov %s4016_s30 }
 0x757   : > { %s4593_s24 = smov %s4004_s27  ;;  %19 = sbr.rel (!%p17_p1) target bundleno = 4 (0x4), region = 137 }
 0x75c   :  { %3235 = vsyncpa [#allocation4], 1 }
 0x75d   :  { %3237 = vsyncpa [#allocation4 + $0x1], 1 }
 0x75e   :  { %3238 = vsyncpa [#allocation5], 1 }
 0x75f   :  { %3240 = vsyncpa [#allocation5 + $0x1], 1 }

</bundles_post_ra>
